<compile_context>
chip_gen: v7x
topology: tpu7x:2x2x1
jax: 0.10.0
libtpu: 0.0.40
codegen_flags: <defaults>
</compile_context>

<pallas_src>
import functools

import jax
import jax.numpy as jnp
from jax import lax
from jax.experimental import pallas as pl
from jax.experimental.pallas import tpu as pltpu


def transformer_kernel(x_ref, mask_ref, embed_wT, embed_b, pos_emb,
                       sa_in_wT, sa_in_b, sa_out_w3, sa_out_b, ca_const,
                       ln1_w, ln1_b, ln2_w, ln2_b, ln3_w, ln3_b,
                       ff1_wT, ff1_b, ff2_wT, ff2_b,
                       fc_wT, fc_b, out_ref, *, n_head, num_layers):
    D = embed_wT.shape[1]
    hd = D // n_head
    scale = 1.0 / float(hd) ** 0.5
    bf16 = jnp.bfloat16

    # ---- embedding + positional embedding on the whole (Bblk*S, V) slab ----
    x = x_ref[...].astype(bf16)                                      # (BS, V)
    h = jnp.dot(x, embed_wT[...], preferred_element_type=jnp.float32)
    h = h + embed_b[...] + pos_emb[...]                              # (BS, D) f32

    mask_bias = mask_ref[...]                                        # (BS, BS) f32

    def layer_norm(v, w_ref, b_ref, l):                              # f32 stats
        mu = jnp.mean(v, axis=-1, keepdims=True)
        c = v - mu
        var = jnp.mean(c * c, axis=-1, keepdims=True)
        return c * lax.rsqrt(var + 1e-5) * w_ref[l] + b_ref[l]

    for l in range(num_layers):
        # ---- masked multi-head self-attention (heads batched) ----
        qkv = jnp.dot(h.astype(bf16), sa_in_wT[l],
                      preferred_element_type=jnp.float32) + sa_in_b[l]  # (BS,3D)

        def split_heads(base):
            # (BS, D) column group -> (H, BS, hd) bf16 for the MXU
            return jnp.stack(
                [qkv[:, base + i * hd: base + (i + 1) * hd]
                 for i in range(n_head)], axis=0).astype(bf16)

        qh = split_heads(0)
        kh = split_heads(D)
        vh = split_heads(2 * D)

        s = jnp.einsum('hqd,hkd->hqk', qh, kh,
                       preferred_element_type=jnp.float32)           # (H,BS,BS)
        s = s * scale + mask_bias                                    # block-diag causal
        s = s - jnp.max(s, axis=-1, keepdims=True)
        p = jnp.exp(s)
        p = p * pl.reciprocal(jnp.sum(p, axis=-1, keepdims=True), approx=True)
        o = jnp.einsum('hqk,hkd->hqd', p.astype(bf16), vh,
                       preferred_element_type=jnp.float32)           # (H,BS,hd)
        # head merge folded into the out-projection: batched matmul + sum(H)
        sa = jnp.einsum('hqd,hdk->hqk', o.astype(bf16), sa_out_w3[l],
                        preferred_element_type=jnp.float32)          # (H,BS,D)
        sa = jnp.sum(sa, axis=0) + sa_out_b[l]
        h = layer_norm(h + sa, ln1_w, ln1_b, l)

        # ---- cross-attention with zero memory: precomputed constant row ----
        h = layer_norm(h + ca_const[l], ln2_w, ln2_b, l)

        # ---- feed-forward (ReLU) ----
        f = jnp.dot(h.astype(bf16), ff1_wT[l],
                    preferred_element_type=jnp.float32) + ff1_b[l]
        f = jnp.maximum(f, 0.0)
        f = jnp.dot(f.astype(bf16), ff2_wT[l],
                    preferred_element_type=jnp.float32) + ff2_b[l]
        h = layer_norm(h + f, ln3_w, ln3_b, l)

    # ---- output projection ----
    out_ref[...] = jnp.dot(h.astype(bf16), fc_wT[...],
                           preferred_element_type=jnp.float32) + fc_b[...]


def init_params(key, V, D, L, FF, max_pos=1024):
    names_shapes = [
        ("embed_wT", (V, D)), ("embed_b", (1, D)),
        ("pos_table", (max_pos, D)),
        ("sa_in_wT", (L, D, 3 * D)), ("sa_in_b", (L, 1, 3 * D)),
        ("sa_out_wT", (L, D, D)), ("sa_out_b", (L, 1, D)),
        ("ca_in_b", (L, 1, 3 * D)),
        ("ca_out_wT", (L, D, D)), ("ca_out_b", (L, 1, D)),
        ("ff1_wT", (L, D, FF)), ("ff1_b", (L, 1, FF)),
        ("ff2_wT", (L, FF, D)), ("ff2_b", (L, 1, D)),
        ("fc_wT", (D, V)), ("fc_b", (1, V)),
    ]
    keys = jax.random.split(key, len(names_shapes))
    params = {n: (0.05 * jax.random.normal(k, s)).astype(jnp.float32)
              for (n, s), k in zip(names_shapes, keys)}
    for i in (1, 2, 3):  # LayerNorm: gamma=1, beta=0 (PyTorch init)
        params[f"ln{i}_w"] = jnp.ones((L, 1, D), jnp.float32)
        params[f"ln{i}_b"] = jnp.zeros((L, 1, D), jnp.float32)
    return params


def mini_transformer(x, params, *, n_head, num_layers, num_batch_blocks=1):
    # num_batch_blocks=1: whole batch in one grid step (v5e/v6e, 1 TensorCore).
    # On v7x pass num_batch_blocks=2 so the "parallel" axis spans both cores.
    B, S, V = x.shape
    D = params["embed_wT"].shape[1]
    L, H = num_layers, n_head
    assert B % num_batch_blocks == 0
    Bblk = B // num_batch_blocks
    BS = Bblk * S

    bf16 = jnp.bfloat16
    # --- glue: weights to bf16 for the MXU; biases/LN/constants stay f32 ---
    embed_wT = params["embed_wT"].astype(bf16)
    sa_in_wT = params["sa_in_wT"].astype(bf16)
    sa_out_w3 = params["sa_out_wT"].reshape(L, H, D // H, D).astype(bf16)
    ff1_wT = params["ff1_wT"].astype(bf16)
    ff2_wT = params["ff2_wT"].astype(bf16)
    fc_wT = params["fc_wT"].astype(bf16)

    # positional rows, tiled over the batch rows folded into one block
    pos_emb = jnp.tile(params["pos_table"][:S], (Bblk, 1))            # (BS, D)

    # cross-attention with zero memory: K/V of zeros are their biases, softmax
    # over a single key is 1  ->  constant row out_proj(v_bias) + out_bias.
    ca_v_b = params["ca_in_b"][:, :, 2 * D:3 * D]                     # (L,1,D)
    ca_const = (jnp.einsum('lkd,lde->lke', ca_v_b, params["ca_out_wT"])
                + params["ca_out_b"]).astype(jnp.float32)             # (L,1,D)

    # additive block-diagonal causal mask bias over the folded (Bblk*S) rows
    r = jnp.arange(BS)
    same_seq = (r[:, None] // S) == (r[None, :] // S)
    causal = (r[None, :] % S) <= (r[:, None] % S)
    mask_bias = jnp.where(same_seq & causal, 0.0, -1e30).astype(jnp.float32)

    x_flat = x.reshape(B * S, V).astype(jnp.float32)

    ordered = [
        mask_bias, embed_wT, params["embed_b"], pos_emb,
        sa_in_wT, params["sa_in_b"], sa_out_w3, params["sa_out_b"], ca_const,
        params["ln1_w"], params["ln1_b"], params["ln2_w"], params["ln2_b"],
        params["ln3_w"], params["ln3_b"],
        ff1_wT, params["ff1_b"], ff2_wT, params["ff2_b"],
        fc_wT, params["fc_b"],
    ]

    def full_spec(shape):
        nd = len(shape)
        return pl.BlockSpec(shape, lambda g, _nd=nd: (0,) * _nd)

    in_specs = [pl.BlockSpec((BS, V), lambda g: (g, 0))]
    in_specs += [full_spec(p.shape) for p in ordered]

    kernel = functools.partial(transformer_kernel,
                               n_head=n_head, num_layers=num_layers)
    out = pl.pallas_call(
        kernel,
        out_shape=jax.ShapeDtypeStruct((B * S, V), jnp.float32),
        grid=(num_batch_blocks,),
        in_specs=in_specs,
        out_specs=pl.BlockSpec((BS, V), lambda g: (g, 0)),
        compiler_params=pltpu.CompilerParams(
            dimension_semantics=("parallel",)),
    )(x_flat, *ordered)
    return out.reshape(B, S, V)


if __name__ == "__main__":
    # small shapes consistent with the module's forward
    B, S, V = 2, 8, 16            # batch, seq, vocab
    D, H, L, FF = 64, 4, 2, 128   # d_model, n_head, num_layers, dim_feedforward

    key = jax.random.PRNGKey(0)
    pkey, xkey = jax.random.split(key)
    params = init_params(pkey, V, D, L, FF)

    tokens = jax.random.randint(xkey, (B, S), 0, V)
    x = jax.nn.one_hot(tokens, V, dtype=jnp.float32)   # (B, S, V) float input

    logits = mini_transformer(x, params, n_head=H, num_layers=L)
    logits = jax.block_until_ready(logits)

    assert logits.shape == (B, S, V), logits.shape
    assert bool(jnp.all(jnp.isfinite(logits)))
    print("KERNEL_OK")
</pallas_src>

<mosaic_0001>
module attributes {stable_mosaic.version = 11 : i64} {
  func.func @transformer_kernel(%arg0: i32, %arg1: memref<16x16xf32, #tpu.memory_space<vmem>>, %arg2: memref<16x16xf32, #tpu.memory_space<vmem>>, %arg3: memref<16x64xbf16, #tpu.memory_space<vmem>>, %arg4: memref<1x64xf32, #tpu.memory_space<vmem>>, %arg5: memref<16x64xf32, #tpu.memory_space<vmem>>, %arg6: memref<2x64x192xbf16, #tpu.memory_space<vmem>>, %arg7: memref<2x1x192xf32, #tpu.memory_space<vmem>>, %arg8: memref<2x4x16x64xbf16, #tpu.memory_space<vmem>>, %arg9: memref<2x1x64xf32, #tpu.memory_space<vmem>>, %arg10: memref<2x1x64xf32, #tpu.memory_space<vmem>>, %arg11: memref<2x1x64xf32, #tpu.memory_space<vmem>>, %arg12: memref<2x1x64xf32, #tpu.memory_space<vmem>>, %arg13: memref<2x1x64xf32, #tpu.memory_space<vmem>>, %arg14: memref<2x1x64xf32, #tpu.memory_space<vmem>>, %arg15: memref<2x1x64xf32, #tpu.memory_space<vmem>>, %arg16: memref<2x1x64xf32, #tpu.memory_space<vmem>>, %arg17: memref<2x64x128xbf16, #tpu.memory_space<vmem>>, %arg18: memref<2x1x128xf32, #tpu.memory_space<vmem>>, %arg19: memref<2x128x64xbf16, #tpu.memory_space<vmem>>, %arg20: memref<2x1x64xf32, #tpu.memory_space<vmem>>, %arg21: memref<64x16xbf16, #tpu.memory_space<vmem>>, %arg22: memref<1x16xf32, #tpu.memory_space<vmem>>, %arg23: memref<16x16xf32, #tpu.memory_space<vmem>>) attributes {dimension_semantics = [#tpu.dimension_semantics<parallel>], iteration_bounds = array<i64: 1>, scalar_prefetch = 0 : i64, scratch_operands = 0 : i64, tpu.core_type = #tpu.core_type<tc>, window_params = [{transform_indices = @transform_0, window_bounds = array<i64: 16, 16>}, {pipeline_mode = #tpu.pipeline_mode<synchronous>, transform_indices = @transform_1, window_bounds = array<i64: 16, 16>}, {pipeline_mode = #tpu.pipeline_mode<synchronous>, transform_indices = @transform_2, window_bounds = array<i64: 16, 64>}, {pipeline_mode = #tpu.pipeline_mode<synchronous>, transform_indices = @transform_3, window_bounds = array<i64: 1, 64>}, {pipeline_mode = #tpu.pipeline_mode<synchronous>, transform_indices = @transform_4, window_bounds = array<i64: 16, 64>}, {pipeline_mode = #tpu.pipeline_mode<synchronous>, transform_indices = @transform_5, window_bounds = array<i64: 2, 64, 192>}, {pipeline_mode = #tpu.pipeline_mode<synchronous>, transform_indices = @transform_6, window_bounds = array<i64: 2, 1, 192>}, {pipeline_mode = #tpu.pipeline_mode<synchronous>, transform_indices = @transform_7, window_bounds = array<i64: 2, 4, 16, 64>}, {pipeline_mode = #tpu.pipeline_mode<synchronous>, transform_indices = @transform_8, window_bounds = array<i64: 2, 1, 64>}, {pipeline_mode = #tpu.pipeline_mode<synchronous>, transform_indices = @transform_9, window_bounds = array<i64: 2, 1, 64>}, {pipeline_mode = #tpu.pipeline_mode<synchronous>, transform_indices = @transform_10, window_bounds = array<i64: 2, 1, 64>}, {pipeline_mode = #tpu.pipeline_mode<synchronous>, transform_indices = @transform_11, window_bounds = array<i64: 2, 1, 64>}, {pipeline_mode = #tpu.pipeline_mode<synchronous>, transform_indices = @transform_12, window_bounds = array<i64: 2, 1, 64>}, {pipeline_mode = #tpu.pipeline_mode<synchronous>, transform_indices = @transform_13, window_bounds = array<i64: 2, 1, 64>}, {pipeline_mode = #tpu.pipeline_mode<synchronous>, transform_indices = @transform_14, window_bounds = array<i64: 2, 1, 64>}, {pipeline_mode = #tpu.pipeline_mode<synchronous>, transform_indices = @transform_15, window_bounds = array<i64: 2, 1, 64>}, {pipeline_mode = #tpu.pipeline_mode<synchronous>, transform_indices = @transform_16, window_bounds = array<i64: 2, 64, 128>}, {pipeline_mode = #tpu.pipeline_mode<synchronous>, transform_indices = @transform_17, window_bounds = array<i64: 2, 1, 128>}, {pipeline_mode = #tpu.pipeline_mode<synchronous>, transform_indices = @transform_18, window_bounds = array<i64: 2, 128, 64>}, {pipeline_mode = #tpu.pipeline_mode<synchronous>, transform_indices = @transform_19, window_bounds = array<i64: 2, 1, 64>}, {pipeline_mode = #tpu.pipeline_mode<synchronous>, transform_indices = @transform_20, window_bounds = array<i64: 64, 16>}, {pipeline_mode = #tpu.pipeline_mode<synchronous>, transform_indices = @transform_21, window_bounds = array<i64: 1, 16>}, {transform_indices = @transform_22, window_bounds = array<i64: 16, 16>}]} {
    %c0 = arith.constant 0 : index
    %c0_0 = arith.constant 0 : index
    %0 = vector.load %arg1[%c0, %c0_0] : memref<16x16xf32, #tpu.memory_space<vmem>>, vector<16x16xf32>
    %1 = arith.truncf %0 : vector<16x16xf32> to vector<16x16xbf16>
    %c0_1 = arith.constant 0 : index
    %c0_2 = arith.constant 0 : index
    %2 = vector.load %arg3[%c0_1, %c0_2] : memref<16x64xbf16, #tpu.memory_space<vmem>>, vector<16x64xbf16>
    %cst = arith.constant dense<0.000000e+00> : vector<16x64xf32>
    %3 = tpu.matmul %1, %2, %cst {dimension_numbers = #tpu.dot_dimension_numbers<[1], [0], [0], [1], [0, 0, 1, 1], [], []>} : vector<16x16xbf16>, vector<16x64xbf16>, vector<16x64xf32> -> vector<16x64xf32>
    %c0_3 = arith.constant 0 : index
    %c0_4 = arith.constant 0 : index
    %4 = vector.load %arg4[%c0_3, %c0_4] : memref<1x64xf32, #tpu.memory_space<vmem>>, vector<1x64xf32>
    %5 = vector.broadcast %4 : vector<1x64xf32> to vector<16x64xf32>
    %6 = arith.addf %3, %5 : vector<16x64xf32>
    %c0_5 = arith.constant 0 : index
    %c0_6 = arith.constant 0 : index
    %7 = vector.load %arg5[%c0_5, %c0_6] : memref<16x64xf32, #tpu.memory_space<vmem>>, vector<16x64xf32>
    %8 = arith.addf %6, %7 : vector<16x64xf32>
    %c0_7 = arith.constant 0 : index
    %c0_8 = arith.constant 0 : index
    %9 = vector.load %arg2[%c0_7, %c0_8] : memref<16x16xf32, #tpu.memory_space<vmem>>, vector<16x16xf32>
    %10 = arith.truncf %8 : vector<16x64xf32> to vector<16x64xbf16>
    %c0_9 = arith.constant 0 : index
    %c0_10 = arith.constant 0 : index
    %c0_11 = arith.constant 0 : index
    %11 = vector.load %arg6[%c0_9, %c0_10, %c0_11] : memref<2x64x192xbf16, #tpu.memory_space<vmem>>, vector<1x64x192xbf16>
    %12 = vector.shape_cast %11 : vector<1x64x192xbf16> to vector<64x192xbf16>
    %cst_12 = arith.constant dense<0.000000e+00> : vector<16x192xf32>
    %13 = tpu.matmul %10, %12, %cst_12 {dimension_numbers = #tpu.dot_dimension_numbers<[1], [0], [0], [1], [0, 0, 1, 1], [], []>} : vector<16x64xbf16>, vector<64x192xbf16>, vector<16x192xf32> -> vector<16x192xf32>
    %c0_13 = arith.constant 0 : index
    %c0_14 = arith.constant 0 : index
    %c0_15 = arith.constant 0 : index
    %14 = vector.load %arg7[%c0_13, %c0_14, %c0_15] : memref<2x1x192xf32, #tpu.memory_space<vmem>>, vector<1x1x192xf32>
    %15 = vector.shape_cast %14 : vector<1x1x192xf32> to vector<1x192xf32>
    %16 = vector.broadcast %15 : vector<1x192xf32> to vector<16x192xf32>
    %17 = arith.addf %13, %16 : vector<16x192xf32>
    %18 = vector.extract_strided_slice %17 {offsets = [0, 0], sizes = [16, 16], strides = [1, 1]} : vector<16x192xf32> to vector<16x16xf32>
    %19 = vector.extract_strided_slice %17 {offsets = [0, 16], sizes = [16, 16], strides = [1, 1]} : vector<16x192xf32> to vector<16x16xf32>
    %20 = vector.extract_strided_slice %17 {offsets = [0, 32], sizes = [16, 16], strides = [1, 1]} : vector<16x192xf32> to vector<16x16xf32>
    %21 = vector.extract_strided_slice %17 {offsets = [0, 48], sizes = [16, 16], strides = [1, 1]} : vector<16x192xf32> to vector<16x16xf32>
    %22 = vector.shape_cast %18 : vector<16x16xf32> to vector<1x16x16xf32>
    %23 = vector.shape_cast %19 : vector<16x16xf32> to vector<1x16x16xf32>
    %24 = vector.shape_cast %20 : vector<16x16xf32> to vector<1x16x16xf32>
    %25 = vector.shape_cast %21 : vector<16x16xf32> to vector<1x16x16xf32>
    %26 = tpu.concatenate %22, %23, %24, %25 in 0 : vector<1x16x16xf32>, vector<1x16x16xf32>, vector<1x16x16xf32>, vector<1x16x16xf32> -> vector<4x16x16xf32>
    %27 = arith.truncf %26 : vector<4x16x16xf32> to vector<4x16x16xbf16>
    %28 = vector.extract_strided_slice %17 {offsets = [0, 64], sizes = [16, 16], strides = [1, 1]} : vector<16x192xf32> to vector<16x16xf32>
    %29 = vector.extract_strided_slice %17 {offsets = [0, 80], sizes = [16, 16], strides = [1, 1]} : vector<16x192xf32> to vector<16x16xf32>
    %30 = vector.extract_strided_slice %17 {offsets = [0, 96], sizes = [16, 16], strides = [1, 1]} : vector<16x192xf32> to vector<16x16xf32>
    %31 = vector.extract_strided_slice %17 {offsets = [0, 112], sizes = [16, 16], strides = [1, 1]} : vector<16x192xf32> to vector<16x16xf32>
    %32 = vector.shape_cast %28 : vector<16x16xf32> to vector<1x16x16xf32>
    %33 = vector.shape_cast %29 : vector<16x16xf32> to vector<1x16x16xf32>
    %34 = vector.shape_cast %30 : vector<16x16xf32> to vector<1x16x16xf32>
    %35 = vector.shape_cast %31 : vector<16x16xf32> to vector<1x16x16xf32>
    %36 = tpu.concatenate %32, %33, %34, %35 in 0 : vector<1x16x16xf32>, vector<1x16x16xf32>, vector<1x16x16xf32>, vector<1x16x16xf32> -> vector<4x16x16xf32>
    %37 = arith.truncf %36 : vector<4x16x16xf32> to vector<4x16x16xbf16>
    %38 = vector.extract_strided_slice %17 {offsets = [0, 128], sizes = [16, 16], strides = [1, 1]} : vector<16x192xf32> to vector<16x16xf32>
    %39 = vector.extract_strided_slice %17 {offsets = [0, 144], sizes = [16, 16], strides = [1, 1]} : vector<16x192xf32> to vector<16x16xf32>
    %40 = vector.extract_strided_slice %17 {offsets = [0, 160], sizes = [16, 16], strides = [1, 1]} : vector<16x192xf32> to vector<16x16xf32>
    %41 = vector.extract_strided_slice %17 {offsets = [0, 176], sizes = [16, 16], strides = [1, 1]} : vector<16x192xf32> to vector<16x16xf32>
    %42 = vector.shape_cast %38 : vector<16x16xf32> to vector<1x16x16xf32>
    %43 = vector.shape_cast %39 : vector<16x16xf32> to vector<1x16x16xf32>
    %44 = vector.shape_cast %40 : vector<16x16xf32> to vector<1x16x16xf32>
    %45 = vector.shape_cast %41 : vector<16x16xf32> to vector<1x16x16xf32>
    %46 = tpu.concatenate %42, %43, %44, %45 in 0 : vector<1x16x16xf32>, vector<1x16x16xf32>, vector<1x16x16xf32>, vector<1x16x16xf32> -> vector<4x16x16xf32>
    %47 = arith.truncf %46 : vector<4x16x16xf32> to vector<4x16x16xbf16>
    "tpu.trace_start"() <{level = 10 : i32, message = "hqd,hkd->hqk"}> : () -> ()
    %cst_16 = arith.constant dense<0.000000e+00> : vector<4x16x16xf32>
    %48 = tpu.matmul %27, %37, %cst_16 {dimension_numbers = #tpu.dot_dimension_numbers<[2], [2], [1], [1], [0, 0, 0, 1, 1, 1], [0], [0]>} : vector<4x16x16xbf16>, vector<4x16x16xbf16>, vector<4x16x16xf32> -> vector<4x16x16xf32>
    "tpu.trace_stop"() : () -> ()
    %cst_17 = arith.constant 2.500000e-01 : f32
    %49 = vector.broadcast %cst_17 : f32 to vector<4x16x16xf32>
    %50 = arith.mulf %48, %49 : vector<4x16x16xf32>
    %51 = vector.shape_cast %9 : vector<16x16xf32> to vector<1x16x16xf32>
    %52 = vector.broadcast %51 : vector<1x16x16xf32> to vector<4x16x16xf32>
    %53 = arith.addf %50, %52 : vector<4x16x16xf32>
    %cst_18 = arith.constant dense<0xFF800000> : vector<4x16xf32>
    %54 = vector.multi_reduction <maximumf>, %53, %cst_18 [2] : vector<4x16x16xf32> to vector<4x16xf32>
    %55 = vector.shape_cast %54 : vector<4x16xf32> to vector<4x16x1xf32>
    %56 = vector.broadcast %55 : vector<4x16x1xf32> to vector<4x16x16xf32>
    %57 = arith.subf %53, %56 : vector<4x16x16xf32>
    %58 = math.exp %57 : vector<4x16x16xf32>
    %cst_19 = arith.constant dense<0.000000e+00> : vector<4x16xf32>
    %59 = vector.multi_reduction <add>, %58, %cst_19 [2] : vector<4x16x16xf32> to vector<4x16xf32>
    %60 = vector.shape_cast %59 : vector<4x16xf32> to vector<4x16x1xf32>
    %61 = tpu.reciprocal %60 {approx = true} : vector<4x16x1xf32> -> vector<4x16x1xf32>
    %62 = vector.broadcast %61 : vector<4x16x1xf32> to vector<4x16x16xf32>
    %63 = arith.mulf %58, %62 : vector<4x16x16xf32>
    %64 = arith.truncf %63 : vector<4x16x16xf32> to vector<4x16x16xbf16>
    "tpu.trace_start"() <{level = 10 : i32, message = "hqk,hkd->hqd"}> : () -> ()
    %cst_20 = arith.constant dense<0.000000e+00> : vector<4x16x16xf32>
    %65 = tpu.matmul %64, %47, %cst_20 {dimension_numbers = #tpu.dot_dimension_numbers<[2], [1], [1], [2], [0, 0, 0, 1, 1, 2], [0], [0]>} : vector<4x16x16xbf16>, vector<4x16x16xbf16>, vector<4x16x16xf32> -> vector<4x16x16xf32>
    "tpu.trace_stop"() : () -> ()
    %66 = arith.truncf %65 : vector<4x16x16xf32> to vector<4x16x16xbf16>
    %c0_21 = arith.constant 0 : index
    %c0_22 = arith.constant 0 : index
    %c0_23 = arith.constant 0 : index
    %c0_24 = arith.constant 0 : index
    %67 = vector.load %arg8[%c0_21, %c0_22, %c0_23, %c0_24] : memref<2x4x16x64xbf16, #tpu.memory_space<vmem>>, vector<1x4x16x64xbf16>
    %68 = vector.shape_cast %67 : vector<1x4x16x64xbf16> to vector<4x16x64xbf16>
    "tpu.trace_start"() <{level = 10 : i32, message = "hqd,hdk->hqk"}> : () -> ()
    %cst_25 = arith.constant dense<0.000000e+00> : vector<4x16x64xf32>
    %69 = tpu.matmul %66, %68, %cst_25 {dimension_numbers = #tpu.dot_dimension_numbers<[2], [1], [1], [2], [0, 0, 0, 1, 1, 2], [0], [0]>} : vector<4x16x16xbf16>, vector<4x16x64xbf16>, vector<4x16x64xf32> -> vector<4x16x64xf32>
    "tpu.trace_stop"() : () -> ()
    %cst_26 = arith.constant dense<0.000000e+00> : vector<16x64xf32>
    %70 = vector.multi_reduction <add>, %69, %cst_26 [0] : vector<4x16x64xf32> to vector<16x64xf32>
    %c0_27 = arith.constant 0 : index
    %c0_28 = arith.constant 0 : index
    %c0_29 = arith.constant 0 : index
    %71 = vector.load %arg9[%c0_27, %c0_28, %c0_29] : memref<2x1x64xf32, #tpu.memory_space<vmem>>, vector<1x1x64xf32>
    %72 = vector.shape_cast %71 : vector<1x1x64xf32> to vector<1x64xf32>
    %73 = vector.broadcast %72 : vector<1x64xf32> to vector<16x64xf32>
    %74 = arith.addf %70, %73 : vector<16x64xf32>
    %75 = arith.addf %8, %74 : vector<16x64xf32>
    %cst_30 = arith.constant dense<0.000000e+00> : vector<16xf32>
    %76 = vector.multi_reduction <add>, %75, %cst_30 [1] : vector<16x64xf32> to vector<16xf32>
    %77 = vector.shape_cast %76 : vector<16xf32> to vector<16x1xf32>
    %cst_31 = arith.constant 6.400000e+01 : f32
    %78 = vector.broadcast %cst_31 : f32 to vector<16x1xf32>
    %79 = arith.divf %77, %78 : vector<16x1xf32>
    %80 = vector.broadcast %79 : vector<16x1xf32> to vector<16x64xf32>
    %81 = arith.subf %75, %80 : vector<16x64xf32>
    %82 = arith.mulf %81, %81 : vector<16x64xf32>
    %cst_32 = arith.constant dense<0.000000e+00> : vector<16xf32>
    %83 = vector.multi_reduction <add>, %82, %cst_32 [1] : vector<16x64xf32> to vector<16xf32>
    %84 = vector.shape_cast %83 : vector<16xf32> to vector<16x1xf32>
    %cst_33 = arith.constant 6.400000e+01 : f32
    %85 = vector.broadcast %cst_33 : f32 to vector<16x1xf32>
    %86 = arith.divf %84, %85 : vector<16x1xf32>
    %cst_34 = arith.constant 9.99999974E-6 : f32
    %87 = vector.broadcast %cst_34 : f32 to vector<16x1xf32>
    %88 = arith.addf %86, %87 : vector<16x1xf32>
    %89 = math.rsqrt %88 : vector<16x1xf32>
    %90 = vector.broadcast %89 : vector<16x1xf32> to vector<16x64xf32>
    %91 = arith.mulf %81, %90 : vector<16x64xf32>
    %c0_35 = arith.constant 0 : index
    %c0_36 = arith.constant 0 : index
    %c0_37 = arith.constant 0 : index
    %92 = vector.load %arg11[%c0_35, %c0_36, %c0_37] : memref<2x1x64xf32, #tpu.memory_space<vmem>>, vector<1x1x64xf32>
    %93 = vector.shape_cast %92 : vector<1x1x64xf32> to vector<1x64xf32>
    %94 = vector.broadcast %93 : vector<1x64xf32> to vector<16x64xf32>
    %95 = arith.mulf %91, %94 : vector<16x64xf32>
    %c0_38 = arith.constant 0 : index
    %c0_39 = arith.constant 0 : index
    %c0_40 = arith.constant 0 : index
    %96 = vector.load %arg12[%c0_38, %c0_39, %c0_40] : memref<2x1x64xf32, #tpu.memory_space<vmem>>, vector<1x1x64xf32>
    %97 = vector.shape_cast %96 : vector<1x1x64xf32> to vector<1x64xf32>
    %98 = vector.broadcast %97 : vector<1x64xf32> to vector<16x64xf32>
    %99 = arith.addf %95, %98 : vector<16x64xf32>
    %c0_41 = arith.constant 0 : index
    %c0_42 = arith.constant 0 : index
    %c0_43 = arith.constant 0 : index
    %100 = vector.load %arg10[%c0_41, %c0_42, %c0_43] : memref<2x1x64xf32, #tpu.memory_space<vmem>>, vector<1x1x64xf32>
    %101 = vector.shape_cast %100 : vector<1x1x64xf32> to vector<1x64xf32>
    %102 = vector.broadcast %101 : vector<1x64xf32> to vector<16x64xf32>
    %103 = arith.addf %99, %102 : vector<16x64xf32>
    %cst_44 = arith.constant dense<0.000000e+00> : vector<16xf32>
    %104 = vector.multi_reduction <add>, %103, %cst_44 [1] : vector<16x64xf32> to vector<16xf32>
    %105 = vector.shape_cast %104 : vector<16xf32> to vector<16x1xf32>
    %cst_45 = arith.constant 6.400000e+01 : f32
    %106 = vector.broadcast %cst_45 : f32 to vector<16x1xf32>
    %107 = arith.divf %105, %106 : vector<16x1xf32>
    %108 = vector.broadcast %107 : vector<16x1xf32> to vector<16x64xf32>
    %109 = arith.subf %103, %108 : vector<16x64xf32>
    %110 = arith.mulf %109, %109 : vector<16x64xf32>
    %cst_46 = arith.constant dense<0.000000e+00> : vector<16xf32>
    %111 = vector.multi_reduction <add>, %110, %cst_46 [1] : vector<16x64xf32> to vector<16xf32>
    %112 = vector.shape_cast %111 : vector<16xf32> to vector<16x1xf32>
    %cst_47 = arith.constant 6.400000e+01 : f32
    %113 = vector.broadcast %cst_47 : f32 to vector<16x1xf32>
    %114 = arith.divf %112, %113 : vector<16x1xf32>
    %cst_48 = arith.constant 9.99999974E-6 : f32
    %115 = vector.broadcast %cst_48 : f32 to vector<16x1xf32>
    %116 = arith.addf %114, %115 : vector<16x1xf32>
    %117 = math.rsqrt %116 : vector<16x1xf32>
    %118 = vector.broadcast %117 : vector<16x1xf32> to vector<16x64xf32>
    %119 = arith.mulf %109, %118 : vector<16x64xf32>
    %c0_49 = arith.constant 0 : index
    %c0_50 = arith.constant 0 : index
    %c0_51 = arith.constant 0 : index
    %120 = vector.load %arg13[%c0_49, %c0_50, %c0_51] : memref<2x1x64xf32, #tpu.memory_space<vmem>>, vector<1x1x64xf32>
    %121 = vector.shape_cast %120 : vector<1x1x64xf32> to vector<1x64xf32>
    %122 = vector.broadcast %121 : vector<1x64xf32> to vector<16x64xf32>
    %123 = arith.mulf %119, %122 : vector<16x64xf32>
    %c0_52 = arith.constant 0 : index
    %c0_53 = arith.constant 0 : index
    %c0_54 = arith.constant 0 : index
    %124 = vector.load %arg14[%c0_52, %c0_53, %c0_54] : memref<2x1x64xf32, #tpu.memory_space<vmem>>, vector<1x1x64xf32>
    %125 = vector.shape_cast %124 : vector<1x1x64xf32> to vector<1x64xf32>
    %126 = vector.broadcast %125 : vector<1x64xf32> to vector<16x64xf32>
    %127 = arith.addf %123, %126 : vector<16x64xf32>
    %128 = arith.truncf %127 : vector<16x64xf32> to vector<16x64xbf16>
    %c0_55 = arith.constant 0 : index
    %c0_56 = arith.constant 0 : index
    %c0_57 = arith.constant 0 : index
    %129 = vector.load %arg17[%c0_55, %c0_56, %c0_57] : memref<2x64x128xbf16, #tpu.memory_space<vmem>>, vector<1x64x128xbf16>
    %130 = vector.shape_cast %129 : vector<1x64x128xbf16> to vector<64x128xbf16>
    %cst_58 = arith.constant dense<0.000000e+00> : vector<16x128xf32>
    %131 = tpu.matmul %128, %130, %cst_58 {dimension_numbers = #tpu.dot_dimension_numbers<[1], [0], [0], [1], [0, 0, 1, 1], [], []>} : vector<16x64xbf16>, vector<64x128xbf16>, vector<16x128xf32> -> vector<16x128xf32>
    %c0_59 = arith.constant 0 : index
    %c0_60 = arith.constant 0 : index
    %c0_61 = arith.constant 0 : index
    %132 = vector.load %arg18[%c0_59, %c0_60, %c0_61] : memref<2x1x128xf32, #tpu.memory_space<vmem>>, vector<1x1x128xf32>
    %133 = vector.shape_cast %132 : vector<1x1x128xf32> to vector<1x128xf32>
    %134 = vector.broadcast %133 : vector<1x128xf32> to vector<16x128xf32>
    %135 = arith.addf %131, %134 : vector<16x128xf32>
    %cst_62 = arith.constant 0.000000e+00 : f32
    %136 = vector.broadcast %cst_62 : f32 to vector<16x128xf32>
    %137 = arith.maximumf %135, %136 : vector<16x128xf32>
    %138 = arith.truncf %137 : vector<16x128xf32> to vector<16x128xbf16>
    %c0_63 = arith.constant 0 : index
    %c0_64 = arith.constant 0 : index
    %c0_65 = arith.constant 0 : index
    %139 = vector.load %arg19[%c0_63, %c0_64, %c0_65] : memref<2x128x64xbf16, #tpu.memory_space<vmem>>, vector<1x128x64xbf16>
    %140 = vector.shape_cast %139 : vector<1x128x64xbf16> to vector<128x64xbf16>
    %cst_66 = arith.constant dense<0.000000e+00> : vector<16x64xf32>
    %141 = tpu.matmul %138, %140, %cst_66 {dimension_numbers = #tpu.dot_dimension_numbers<[1], [0], [0], [1], [0, 0, 1, 1], [], []>} : vector<16x128xbf16>, vector<128x64xbf16>, vector<16x64xf32> -> vector<16x64xf32>
    %c0_67 = arith.constant 0 : index
    %c0_68 = arith.constant 0 : index
    %c0_69 = arith.constant 0 : index
    %142 = vector.load %arg20[%c0_67, %c0_68, %c0_69] : memref<2x1x64xf32, #tpu.memory_space<vmem>>, vector<1x1x64xf32>
    %143 = vector.shape_cast %142 : vector<1x1x64xf32> to vector<1x64xf32>
    %144 = vector.broadcast %143 : vector<1x64xf32> to vector<16x64xf32>
    %145 = arith.addf %141, %144 : vector<16x64xf32>
    %146 = arith.addf %127, %145 : vector<16x64xf32>
    %cst_70 = arith.constant dense<0.000000e+00> : vector<16xf32>
    %147 = vector.multi_reduction <add>, %146, %cst_70 [1] : vector<16x64xf32> to vector<16xf32>
    %148 = vector.shape_cast %147 : vector<16xf32> to vector<16x1xf32>
    %cst_71 = arith.constant 6.400000e+01 : f32
    %149 = vector.broadcast %cst_71 : f32 to vector<16x1xf32>
    %150 = arith.divf %148, %149 : vector<16x1xf32>
    %151 = vector.broadcast %150 : vector<16x1xf32> to vector<16x64xf32>
    %152 = arith.subf %146, %151 : vector<16x64xf32>
    %153 = arith.mulf %152, %152 : vector<16x64xf32>
    %cst_72 = arith.constant dense<0.000000e+00> : vector<16xf32>
    %154 = vector.multi_reduction <add>, %153, %cst_72 [1] : vector<16x64xf32> to vector<16xf32>
    %155 = vector.shape_cast %154 : vector<16xf32> to vector<16x1xf32>
    %cst_73 = arith.constant 6.400000e+01 : f32
    %156 = vector.broadcast %cst_73 : f32 to vector<16x1xf32>
    %157 = arith.divf %155, %156 : vector<16x1xf32>
    %cst_74 = arith.constant 9.99999974E-6 : f32
    %158 = vector.broadcast %cst_74 : f32 to vector<16x1xf32>
    %159 = arith.addf %157, %158 : vector<16x1xf32>
    %160 = math.rsqrt %159 : vector<16x1xf32>
    %161 = vector.broadcast %160 : vector<16x1xf32> to vector<16x64xf32>
    %162 = arith.mulf %152, %161 : vector<16x64xf32>
    %c0_75 = arith.constant 0 : index
    %c0_76 = arith.constant 0 : index
    %c0_77 = arith.constant 0 : index
    %163 = vector.load %arg15[%c0_75, %c0_76, %c0_77] : memref<2x1x64xf32, #tpu.memory_space<vmem>>, vector<1x1x64xf32>
    %164 = vector.shape_cast %163 : vector<1x1x64xf32> to vector<1x64xf32>
    %165 = vector.broadcast %164 : vector<1x64xf32> to vector<16x64xf32>
    %166 = arith.mulf %162, %165 : vector<16x64xf32>
    %c0_78 = arith.constant 0 : index
    %c0_79 = arith.constant 0 : index
    %c0_80 = arith.constant 0 : index
    %167 = vector.load %arg16[%c0_78, %c0_79, %c0_80] : memref<2x1x64xf32, #tpu.memory_space<vmem>>, vector<1x1x64xf32>
    %168 = vector.shape_cast %167 : vector<1x1x64xf32> to vector<1x64xf32>
    %169 = vector.broadcast %168 : vector<1x64xf32> to vector<16x64xf32>
    %170 = arith.addf %166, %169 : vector<16x64xf32>
    %171 = arith.truncf %170 : vector<16x64xf32> to vector<16x64xbf16>
    %c1 = arith.constant 1 : index
    %c0_81 = arith.constant 0 : index
    %c0_82 = arith.constant 0 : index
    %172 = vector.load %arg6[%c1, %c0_81, %c0_82] : memref<2x64x192xbf16, #tpu.memory_space<vmem>>, vector<1x64x192xbf16>
    %173 = vector.shape_cast %172 : vector<1x64x192xbf16> to vector<64x192xbf16>
    %cst_83 = arith.constant dense<0.000000e+00> : vector<16x192xf32>
    %174 = tpu.matmul %171, %173, %cst_83 {dimension_numbers = #tpu.dot_dimension_numbers<[1], [0], [0], [1], [0, 0, 1, 1], [], []>} : vector<16x64xbf16>, vector<64x192xbf16>, vector<16x192xf32> -> vector<16x192xf32>
    %c1_84 = arith.constant 1 : index
    %c0_85 = arith.constant 0 : index
    %c0_86 = arith.constant 0 : index
    %175 = vector.load %arg7[%c1_84, %c0_85, %c0_86] : memref<2x1x192xf32, #tpu.memory_space<vmem>>, vector<1x1x192xf32>
    %176 = vector.shape_cast %175 : vector<1x1x192xf32> to vector<1x192xf32>
    %177 = vector.broadcast %176 : vector<1x192xf32> to vector<16x192xf32>
    %178 = arith.addf %174, %177 : vector<16x192xf32>
    %179 = vector.extract_strided_slice %178 {offsets = [0, 0], sizes = [16, 16], strides = [1, 1]} : vector<16x192xf32> to vector<16x16xf32>
    %180 = vector.extract_strided_slice %178 {offsets = [0, 16], sizes = [16, 16], strides = [1, 1]} : vector<16x192xf32> to vector<16x16xf32>
    %181 = vector.extract_strided_slice %178 {offsets = [0, 32], sizes = [16, 16], strides = [1, 1]} : vector<16x192xf32> to vector<16x16xf32>
    %182 = vector.extract_strided_slice %178 {offsets = [0, 48], sizes = [16, 16], strides = [1, 1]} : vector<16x192xf32> to vector<16x16xf32>
    %183 = vector.shape_cast %179 : vector<16x16xf32> to vector<1x16x16xf32>
    %184 = vector.shape_cast %180 : vector<16x16xf32> to vector<1x16x16xf32>
    %185 = vector.shape_cast %181 : vector<16x16xf32> to vector<1x16x16xf32>
    %186 = vector.shape_cast %182 : vector<16x16xf32> to vector<1x16x16xf32>
    %187 = tpu.concatenate %183, %184, %185, %186 in 0 : vector<1x16x16xf32>, vector<1x16x16xf32>, vector<1x16x16xf32>, vector<1x16x16xf32> -> vector<4x16x16xf32>
    %188 = arith.truncf %187 : vector<4x16x16xf32> to vector<4x16x16xbf16>
    %189 = vector.extract_strided_slice %178 {offsets = [0, 64], sizes = [16, 16], strides = [1, 1]} : vector<16x192xf32> to vector<16x16xf32>
    %190 = vector.extract_strided_slice %178 {offsets = [0, 80], sizes = [16, 16], strides = [1, 1]} : vector<16x192xf32> to vector<16x16xf32>
    %191 = vector.extract_strided_slice %178 {offsets = [0, 96], sizes = [16, 16], strides = [1, 1]} : vector<16x192xf32> to vector<16x16xf32>
    %192 = vector.extract_strided_slice %178 {offsets = [0, 112], sizes = [16, 16], strides = [1, 1]} : vector<16x192xf32> to vector<16x16xf32>
    %193 = vector.shape_cast %189 : vector<16x16xf32> to vector<1x16x16xf32>
    %194 = vector.shape_cast %190 : vector<16x16xf32> to vector<1x16x16xf32>
    %195 = vector.shape_cast %191 : vector<16x16xf32> to vector<1x16x16xf32>
    %196 = vector.shape_cast %192 : vector<16x16xf32> to vector<1x16x16xf32>
    %197 = tpu.concatenate %193, %194, %195, %196 in 0 : vector<1x16x16xf32>, vector<1x16x16xf32>, vector<1x16x16xf32>, vector<1x16x16xf32> -> vector<4x16x16xf32>
    %198 = arith.truncf %197 : vector<4x16x16xf32> to vector<4x16x16xbf16>
    %199 = vector.extract_strided_slice %178 {offsets = [0, 128], sizes = [16, 16], strides = [1, 1]} : vector<16x192xf32> to vector<16x16xf32>
    %200 = vector.extract_strided_slice %178 {offsets = [0, 144], sizes = [16, 16], strides = [1, 1]} : vector<16x192xf32> to vector<16x16xf32>
    %201 = vector.extract_strided_slice %178 {offsets = [0, 160], sizes = [16, 16], strides = [1, 1]} : vector<16x192xf32> to vector<16x16xf32>
    %202 = vector.extract_strided_slice %178 {offsets = [0, 176], sizes = [16, 16], strides = [1, 1]} : vector<16x192xf32> to vector<16x16xf32>
    %203 = vector.shape_cast %199 : vector<16x16xf32> to vector<1x16x16xf32>
    %204 = vector.shape_cast %200 : vector<16x16xf32> to vector<1x16x16xf32>
    %205 = vector.shape_cast %201 : vector<16x16xf32> to vector<1x16x16xf32>
    %206 = vector.shape_cast %202 : vector<16x16xf32> to vector<1x16x16xf32>
    %207 = tpu.concatenate %203, %204, %205, %206 in 0 : vector<1x16x16xf32>, vector<1x16x16xf32>, vector<1x16x16xf32>, vector<1x16x16xf32> -> vector<4x16x16xf32>
    %208 = arith.truncf %207 : vector<4x16x16xf32> to vector<4x16x16xbf16>
    "tpu.trace_start"() <{level = 10 : i32, message = "hqd,hkd->hqk"}> : () -> ()
    %cst_87 = arith.constant dense<0.000000e+00> : vector<4x16x16xf32>
    %209 = tpu.matmul %188, %198, %cst_87 {dimension_numbers = #tpu.dot_dimension_numbers<[2], [2], [1], [1], [0, 0, 0, 1, 1, 1], [0], [0]>} : vector<4x16x16xbf16>, vector<4x16x16xbf16>, vector<4x16x16xf32> -> vector<4x16x16xf32>
    "tpu.trace_stop"() : () -> ()
    %cst_88 = arith.constant 2.500000e-01 : f32
    %210 = vector.broadcast %cst_88 : f32 to vector<4x16x16xf32>
    %211 = arith.mulf %209, %210 : vector<4x16x16xf32>
    %212 = vector.shape_cast %9 : vector<16x16xf32> to vector<1x16x16xf32>
    %213 = vector.broadcast %212 : vector<1x16x16xf32> to vector<4x16x16xf32>
    %214 = arith.addf %211, %213 : vector<4x16x16xf32>
    %cst_89 = arith.constant dense<0xFF800000> : vector<4x16xf32>
    %215 = vector.multi_reduction <maximumf>, %214, %cst_89 [2] : vector<4x16x16xf32> to vector<4x16xf32>
    %216 = vector.shape_cast %215 : vector<4x16xf32> to vector<4x16x1xf32>
    %217 = vector.broadcast %216 : vector<4x16x1xf32> to vector<4x16x16xf32>
    %218 = arith.subf %214, %217 : vector<4x16x16xf32>
    %219 = math.exp %218 : vector<4x16x16xf32>
    %cst_90 = arith.constant dense<0.000000e+00> : vector<4x16xf32>
    %220 = vector.multi_reduction <add>, %219, %cst_90 [2] : vector<4x16x16xf32> to vector<4x16xf32>
    %221 = vector.shape_cast %220 : vector<4x16xf32> to vector<4x16x1xf32>
    %222 = tpu.reciprocal %221 {approx = true} : vector<4x16x1xf32> -> vector<4x16x1xf32>
    %223 = vector.broadcast %222 : vector<4x16x1xf32> to vector<4x16x16xf32>
    %224 = arith.mulf %219, %223 : vector<4x16x16xf32>
    %225 = arith.truncf %224 : vector<4x16x16xf32> to vector<4x16x16xbf16>
    "tpu.trace_start"() <{level = 10 : i32, message = "hqk,hkd->hqd"}> : () -> ()
    %cst_91 = arith.constant dense<0.000000e+00> : vector<4x16x16xf32>
    %226 = tpu.matmul %225, %208, %cst_91 {dimension_numbers = #tpu.dot_dimension_numbers<[2], [1], [1], [2], [0, 0, 0, 1, 1, 2], [0], [0]>} : vector<4x16x16xbf16>, vector<4x16x16xbf16>, vector<4x16x16xf32> -> vector<4x16x16xf32>
    "tpu.trace_stop"() : () -> ()
    %227 = arith.truncf %226 : vector<4x16x16xf32> to vector<4x16x16xbf16>
    %c1_92 = arith.constant 1 : index
    %c0_93 = arith.constant 0 : index
    %c0_94 = arith.constant 0 : index
    %c0_95 = arith.constant 0 : index
    %228 = vector.load %arg8[%c1_92, %c0_93, %c0_94, %c0_95] : memref<2x4x16x64xbf16, #tpu.memory_space<vmem>>, vector<1x4x16x64xbf16>
    %229 = vector.shape_cast %228 : vector<1x4x16x64xbf16> to vector<4x16x64xbf16>
    "tpu.trace_start"() <{level = 10 : i32, message = "hqd,hdk->hqk"}> : () -> ()
    %cst_96 = arith.constant dense<0.000000e+00> : vector<4x16x64xf32>
    %230 = tpu.matmul %227, %229, %cst_96 {dimension_numbers = #tpu.dot_dimension_numbers<[2], [1], [1], [2], [0, 0, 0, 1, 1, 2], [0], [0]>} : vector<4x16x16xbf16>, vector<4x16x64xbf16>, vector<4x16x64xf32> -> vector<4x16x64xf32>
    "tpu.trace_stop"() : () -> ()
    %cst_97 = arith.constant dense<0.000000e+00> : vector<16x64xf32>
    %231 = vector.multi_reduction <add>, %230, %cst_97 [0] : vector<4x16x64xf32> to vector<16x64xf32>
    %c1_98 = arith.constant 1 : index
    %c0_99 = arith.constant 0 : index
    %c0_100 = arith.constant 0 : index
    %232 = vector.load %arg9[%c1_98, %c0_99, %c0_100] : memref<2x1x64xf32, #tpu.memory_space<vmem>>, vector<1x1x64xf32>
    %233 = vector.shape_cast %232 : vector<1x1x64xf32> to vector<1x64xf32>
    %234 = vector.broadcast %233 : vector<1x64xf32> to vector<16x64xf32>
    %235 = arith.addf %231, %234 : vector<16x64xf32>
    %236 = arith.addf %170, %235 : vector<16x64xf32>
    %cst_101 = arith.constant dense<0.000000e+00> : vector<16xf32>
    %237 = vector.multi_reduction <add>, %236, %cst_101 [1] : vector<16x64xf32> to vector<16xf32>
    %238 = vector.shape_cast %237 : vector<16xf32> to vector<16x1xf32>
    %cst_102 = arith.constant 6.400000e+01 : f32
    %239 = vector.broadcast %cst_102 : f32 to vector<16x1xf32>
    %240 = arith.divf %238, %239 : vector<16x1xf32>
    %241 = vector.broadcast %240 : vector<16x1xf32> to vector<16x64xf32>
    %242 = arith.subf %236, %241 : vector<16x64xf32>
    %243 = arith.mulf %242, %242 : vector<16x64xf32>
    %cst_103 = arith.constant dense<0.000000e+00> : vector<16xf32>
    %244 = vector.multi_reduction <add>, %243, %cst_103 [1] : vector<16x64xf32> to vector<16xf32>
    %245 = vector.shape_cast %244 : vector<16xf32> to vector<16x1xf32>
    %cst_104 = arith.constant 6.400000e+01 : f32
    %246 = vector.broadcast %cst_104 : f32 to vector<16x1xf32>
    %247 = arith.divf %245, %246 : vector<16x1xf32>
    %cst_105 = arith.constant 9.99999974E-6 : f32
    %248 = vector.broadcast %cst_105 : f32 to vector<16x1xf32>
    %249 = arith.addf %247, %248 : vector<16x1xf32>
    %250 = math.rsqrt %249 : vector<16x1xf32>
    %251 = vector.broadcast %250 : vector<16x1xf32> to vector<16x64xf32>
    %252 = arith.mulf %242, %251 : vector<16x64xf32>
    %c1_106 = arith.constant 1 : index
    %c0_107 = arith.constant 0 : index
    %c0_108 = arith.constant 0 : index
    %253 = vector.load %arg11[%c1_106, %c0_107, %c0_108] : memref<2x1x64xf32, #tpu.memory_space<vmem>>, vector<1x1x64xf32>
    %254 = vector.shape_cast %253 : vector<1x1x64xf32> to vector<1x64xf32>
    %255 = vector.broadcast %254 : vector<1x64xf32> to vector<16x64xf32>
    %256 = arith.mulf %252, %255 : vector<16x64xf32>
    %c1_109 = arith.constant 1 : index
    %c0_110 = arith.constant 0 : index
    %c0_111 = arith.constant 0 : index
    %257 = vector.load %arg12[%c1_109, %c0_110, %c0_111] : memref<2x1x64xf32, #tpu.memory_space<vmem>>, vector<1x1x64xf32>
    %258 = vector.shape_cast %257 : vector<1x1x64xf32> to vector<1x64xf32>
    %259 = vector.broadcast %258 : vector<1x64xf32> to vector<16x64xf32>
    %260 = arith.addf %256, %259 : vector<16x64xf32>
    %c1_112 = arith.constant 1 : index
    %c0_113 = arith.constant 0 : index
    %c0_114 = arith.constant 0 : index
    %261 = vector.load %arg10[%c1_112, %c0_113, %c0_114] : memref<2x1x64xf32, #tpu.memory_space<vmem>>, vector<1x1x64xf32>
    %262 = vector.shape_cast %261 : vector<1x1x64xf32> to vector<1x64xf32>
    %263 = vector.broadcast %262 : vector<1x64xf32> to vector<16x64xf32>
    %264 = arith.addf %260, %263 : vector<16x64xf32>
    %cst_115 = arith.constant dense<0.000000e+00> : vector<16xf32>
    %265 = vector.multi_reduction <add>, %264, %cst_115 [1] : vector<16x64xf32> to vector<16xf32>
    %266 = vector.shape_cast %265 : vector<16xf32> to vector<16x1xf32>
    %cst_116 = arith.constant 6.400000e+01 : f32
    %267 = vector.broadcast %cst_116 : f32 to vector<16x1xf32>
    %268 = arith.divf %266, %267 : vector<16x1xf32>
    %269 = vector.broadcast %268 : vector<16x1xf32> to vector<16x64xf32>
    %270 = arith.subf %264, %269 : vector<16x64xf32>
    %271 = arith.mulf %270, %270 : vector<16x64xf32>
    %cst_117 = arith.constant dense<0.000000e+00> : vector<16xf32>
    %272 = vector.multi_reduction <add>, %271, %cst_117 [1] : vector<16x64xf32> to vector<16xf32>
    %273 = vector.shape_cast %272 : vector<16xf32> to vector<16x1xf32>
    %cst_118 = arith.constant 6.400000e+01 : f32
    %274 = vector.broadcast %cst_118 : f32 to vector<16x1xf32>
    %275 = arith.divf %273, %274 : vector<16x1xf32>
    %cst_119 = arith.constant 9.99999974E-6 : f32
    %276 = vector.broadcast %cst_119 : f32 to vector<16x1xf32>
    %277 = arith.addf %275, %276 : vector<16x1xf32>
    %278 = math.rsqrt %277 : vector<16x1xf32>
    %279 = vector.broadcast %278 : vector<16x1xf32> to vector<16x64xf32>
    %280 = arith.mulf %270, %279 : vector<16x64xf32>
    %c1_120 = arith.constant 1 : index
    %c0_121 = arith.constant 0 : index
    %c0_122 = arith.constant 0 : index
    %281 = vector.load %arg13[%c1_120, %c0_121, %c0_122] : memref<2x1x64xf32, #tpu.memory_space<vmem>>, vector<1x1x64xf32>
    %282 = vector.shape_cast %281 : vector<1x1x64xf32> to vector<1x64xf32>
    %283 = vector.broadcast %282 : vector<1x64xf32> to vector<16x64xf32>
    %284 = arith.mulf %280, %283 : vector<16x64xf32>
    %c1_123 = arith.constant 1 : index
    %c0_124 = arith.constant 0 : index
    %c0_125 = arith.constant 0 : index
    %285 = vector.load %arg14[%c1_123, %c0_124, %c0_125] : memref<2x1x64xf32, #tpu.memory_space<vmem>>, vector<1x1x64xf32>
    %286 = vector.shape_cast %285 : vector<1x1x64xf32> to vector<1x64xf32>
    %287 = vector.broadcast %286 : vector<1x64xf32> to vector<16x64xf32>
    %288 = arith.addf %284, %287 : vector<16x64xf32>
    %289 = arith.truncf %288 : vector<16x64xf32> to vector<16x64xbf16>
    %c1_126 = arith.constant 1 : index
    %c0_127 = arith.constant 0 : index
    %c0_128 = arith.constant 0 : index
    %290 = vector.load %arg17[%c1_126, %c0_127, %c0_128] : memref<2x64x128xbf16, #tpu.memory_space<vmem>>, vector<1x64x128xbf16>
    %291 = vector.shape_cast %290 : vector<1x64x128xbf16> to vector<64x128xbf16>
    %cst_129 = arith.constant dense<0.000000e+00> : vector<16x128xf32>
    %292 = tpu.matmul %289, %291, %cst_129 {dimension_numbers = #tpu.dot_dimension_numbers<[1], [0], [0], [1], [0, 0, 1, 1], [], []>} : vector<16x64xbf16>, vector<64x128xbf16>, vector<16x128xf32> -> vector<16x128xf32>
    %c1_130 = arith.constant 1 : index
    %c0_131 = arith.constant 0 : index
    %c0_132 = arith.constant 0 : index
    %293 = vector.load %arg18[%c1_130, %c0_131, %c0_132] : memref<2x1x128xf32, #tpu.memory_space<vmem>>, vector<1x1x128xf32>
    %294 = vector.shape_cast %293 : vector<1x1x128xf32> to vector<1x128xf32>
    %295 = vector.broadcast %294 : vector<1x128xf32> to vector<16x128xf32>
    %296 = arith.addf %292, %295 : vector<16x128xf32>
    %cst_133 = arith.constant 0.000000e+00 : f32
    %297 = vector.broadcast %cst_133 : f32 to vector<16x128xf32>
    %298 = arith.maximumf %296, %297 : vector<16x128xf32>
    %299 = arith.truncf %298 : vector<16x128xf32> to vector<16x128xbf16>
    %c1_134 = arith.constant 1 : index
    %c0_135 = arith.constant 0 : index
    %c0_136 = arith.constant 0 : index
    %300 = vector.load %arg19[%c1_134, %c0_135, %c0_136] : memref<2x128x64xbf16, #tpu.memory_space<vmem>>, vector<1x128x64xbf16>
    %301 = vector.shape_cast %300 : vector<1x128x64xbf16> to vector<128x64xbf16>
    %cst_137 = arith.constant dense<0.000000e+00> : vector<16x64xf32>
    %302 = tpu.matmul %299, %301, %cst_137 {dimension_numbers = #tpu.dot_dimension_numbers<[1], [0], [0], [1], [0, 0, 1, 1], [], []>} : vector<16x128xbf16>, vector<128x64xbf16>, vector<16x64xf32> -> vector<16x64xf32>
    %c1_138 = arith.constant 1 : index
    %c0_139 = arith.constant 0 : index
    %c0_140 = arith.constant 0 : index
    %303 = vector.load %arg20[%c1_138, %c0_139, %c0_140] : memref<2x1x64xf32, #tpu.memory_space<vmem>>, vector<1x1x64xf32>
    %304 = vector.shape_cast %303 : vector<1x1x64xf32> to vector<1x64xf32>
    %305 = vector.broadcast %304 : vector<1x64xf32> to vector<16x64xf32>
    %306 = arith.addf %302, %305 : vector<16x64xf32>
    %307 = arith.addf %288, %306 : vector<16x64xf32>
    %cst_141 = arith.constant dense<0.000000e+00> : vector<16xf32>
    %308 = vector.multi_reduction <add>, %307, %cst_141 [1] : vector<16x64xf32> to vector<16xf32>
    %309 = vector.shape_cast %308 : vector<16xf32> to vector<16x1xf32>
    %cst_142 = arith.constant 6.400000e+01 : f32
    %310 = vector.broadcast %cst_142 : f32 to vector<16x1xf32>
    %311 = arith.divf %309, %310 : vector<16x1xf32>
    %312 = vector.broadcast %311 : vector<16x1xf32> to vector<16x64xf32>
    %313 = arith.subf %307, %312 : vector<16x64xf32>
    %314 = arith.mulf %313, %313 : vector<16x64xf32>
    %cst_143 = arith.constant dense<0.000000e+00> : vector<16xf32>
    %315 = vector.multi_reduction <add>, %314, %cst_143 [1] : vector<16x64xf32> to vector<16xf32>
    %316 = vector.shape_cast %315 : vector<16xf32> to vector<16x1xf32>
    %cst_144 = arith.constant 6.400000e+01 : f32
    %317 = vector.broadcast %cst_144 : f32 to vector<16x1xf32>
    %318 = arith.divf %316, %317 : vector<16x1xf32>
    %cst_145 = arith.constant 9.99999974E-6 : f32
    %319 = vector.broadcast %cst_145 : f32 to vector<16x1xf32>
    %320 = arith.addf %318, %319 : vector<16x1xf32>
    %321 = math.rsqrt %320 : vector<16x1xf32>
    %322 = vector.broadcast %321 : vector<16x1xf32> to vector<16x64xf32>
    %323 = arith.mulf %313, %322 : vector<16x64xf32>
    %c1_146 = arith.constant 1 : index
    %c0_147 = arith.constant 0 : index
    %c0_148 = arith.constant 0 : index
    %324 = vector.load %arg15[%c1_146, %c0_147, %c0_148] : memref<2x1x64xf32, #tpu.memory_space<vmem>>, vector<1x1x64xf32>
    %325 = vector.shape_cast %324 : vector<1x1x64xf32> to vector<1x64xf32>
    %326 = vector.broadcast %325 : vector<1x64xf32> to vector<16x64xf32>
    %327 = arith.mulf %323, %326 : vector<16x64xf32>
    %c1_149 = arith.constant 1 : index
    %c0_150 = arith.constant 0 : index
    %c0_151 = arith.constant 0 : index
    %328 = vector.load %arg16[%c1_149, %c0_150, %c0_151] : memref<2x1x64xf32, #tpu.memory_space<vmem>>, vector<1x1x64xf32>
    %329 = vector.shape_cast %328 : vector<1x1x64xf32> to vector<1x64xf32>
    %330 = vector.broadcast %329 : vector<1x64xf32> to vector<16x64xf32>
    %331 = arith.addf %327, %330 : vector<16x64xf32>
    %332 = arith.truncf %331 : vector<16x64xf32> to vector<16x64xbf16>
    %c0_152 = arith.constant 0 : index
    %c0_153 = arith.constant 0 : index
    %333 = vector.load %arg21[%c0_152, %c0_153] : memref<64x16xbf16, #tpu.memory_space<vmem>>, vector<64x16xbf16>
    %cst_154 = arith.constant dense<0.000000e+00> : vector<16x16xf32>
    %334 = tpu.matmul %332, %333, %cst_154 {dimension_numbers = #tpu.dot_dimension_numbers<[1], [0], [0], [1], [0, 0, 1, 1], [], []>} : vector<16x64xbf16>, vector<64x16xbf16>, vector<16x16xf32> -> vector<16x16xf32>
    %c0_155 = arith.constant 0 : index
    %c0_156 = arith.constant 0 : index
    %335 = vector.load %arg22[%c0_155, %c0_156] : memref<1x16xf32, #tpu.memory_space<vmem>>, vector<1x16xf32>
    %336 = vector.broadcast %335 : vector<1x16xf32> to vector<16x16xf32>
    %337 = arith.addf %334, %336 : vector<16x16xf32>
    %c0_157 = arith.constant 0 : index
    %c0_158 = arith.constant 0 : index
    %338 = vector.load %arg23[%c0_157, %c0_158] : memref<16x16xf32, #tpu.memory_space<vmem>>, vector<16x16xf32>
    tpu.vector_store %arg23[%c0_157, %c0_158], %337 {strides = array<i32>} : memref<16x16xf32, #tpu.memory_space<vmem>>, vector<16x16xf32>,
    return
  }
  func.func @transform_0(%arg0: i32) -> (i32, i32) {
    %c0_i32 = arith.constant 0 : i32
    %c0_i32_0 = arith.constant 0 : i32
    return %arg0, %c0_i32 : i32, i32
  }
  func.func @transform_1(%arg0: i32) -> (i32, i32) {
    %c0_i32 = arith.constant 0 : i32
    %c0_i32_0 = arith.constant 0 : i32
    %c0_i32_1 = arith.constant 0 : i32
    return %c0_i32, %c0_i32_0 : i32, i32
  }
  func.func @transform_2(%arg0: i32) -> (i32, i32) {
    %c0_i32 = arith.constant 0 : i32
    %c0_i32_0 = arith.constant 0 : i32
    %c0_i32_1 = arith.constant 0 : i32
    return %c0_i32, %c0_i32_0 : i32, i32
  }
  func.func @transform_3(%arg0: i32) -> (i32, i32) {
    %c0_i32 = arith.constant 0 : i32
    %c0_i32_0 = arith.constant 0 : i32
    %c0_i32_1 = arith.constant 0 : i32
    return %c0_i32, %c0_i32_0 : i32, i32
  }
  func.func @transform_4(%arg0: i32) -> (i32, i32) {
    %c0_i32 = arith.constant 0 : i32
    %c0_i32_0 = arith.constant 0 : i32
    %c0_i32_1 = arith.constant 0 : i32
    return %c0_i32, %c0_i32_0 : i32, i32
  }
  func.func @transform_5(%arg0: i32) -> (i32, i32, i32) {
    %c0_i32 = arith.constant 0 : i32
    %c0_i32_0 = arith.constant 0 : i32
    %c0_i32_1 = arith.constant 0 : i32
    %c0_i32_2 = arith.constant 0 : i32
    return %c0_i32, %c0_i32_0, %c0_i32_1 : i32, i32, i32
  }
  func.func @transform_6(%arg0: i32) -> (i32, i32, i32) {
    %c0_i32 = arith.constant 0 : i32
    %c0_i32_0 = arith.constant 0 : i32
    %c0_i32_1 = arith.constant 0 : i32
    %c0_i32_2 = arith.constant 0 : i32
    return %c0_i32, %c0_i32_0, %c0_i32_1 : i32, i32, i32
  }
  func.func @transform_7(%arg0: i32) -> (i32, i32, i32, i32) {
    %c0_i32 = arith.constant 0 : i32
    %c0_i32_0 = arith.constant 0 : i32
    %c0_i32_1 = arith.constant 0 : i32
    %c0_i32_2 = arith.constant 0 : i32
    %c0_i32_3 = arith.constant 0 : i32
    return %c0_i32, %c0_i32_0, %c0_i32_1, %c0_i32_2 : i32, i32, i32, i32
  }
  func.func @transform_8(%arg0: i32) -> (i32, i32, i32) {
    %c0_i32 = arith.constant 0 : i32
    %c0_i32_0 = arith.constant 0 : i32
    %c0_i32_1 = arith.constant 0 : i32
    %c0_i32_2 = arith.constant 0 : i32
    return %c0_i32, %c0_i32_0, %c0_i32_1 : i32, i32, i32
  }
  func.func @transform_9(%arg0: i32) -> (i32, i32, i32) {
    %c0_i32 = arith.constant 0 : i32
    %c0_i32_0 = arith.constant 0 : i32
    %c0_i32_1 = arith.constant 0 : i32
    %c0_i32_2 = arith.constant 0 : i32
    return %c0_i32, %c0_i32_0, %c0_i32_1 : i32, i32, i32
  }
  func.func @transform_10(%arg0: i32) -> (i32, i32, i32) {
    %c0_i32 = arith.constant 0 : i32
    %c0_i32_0 = arith.constant 0 : i32
    %c0_i32_1 = arith.constant 0 : i32
    %c0_i32_2 = arith.constant 0 : i32
    return %c0_i32, %c0_i32_0, %c0_i32_1 : i32, i32, i32
  }
  func.func @transform_11(%arg0: i32) -> (i32, i32, i32) {
    %c0_i32 = arith.constant 0 : i32
    %c0_i32_0 = arith.constant 0 : i32
    %c0_i32_1 = arith.constant 0 : i32
    %c0_i32_2 = arith.constant 0 : i32
    return %c0_i32, %c0_i32_0, %c0_i32_1 : i32, i32, i32
  }
  func.func @transform_12(%arg0: i32) -> (i32, i32, i32) {
    %c0_i32 = arith.constant 0 : i32
    %c0_i32_0 = arith.constant 0 : i32
    %c0_i32_1 = arith.constant 0 : i32
    %c0_i32_2 = arith.constant 0 : i32
    return %c0_i32, %c0_i32_0, %c0_i32_1 : i32, i32, i32
  }
  func.func @transform_13(%arg0: i32) -> (i32, i32, i32) {
    %c0_i32 = arith.constant 0 : i32
    %c0_i32_0 = arith.constant 0 : i32
    %c0_i32_1 = arith.constant 0 : i32
    %c0_i32_2 = arith.constant 0 : i32
    return %c0_i32, %c0_i32_0, %c0_i32_1 : i32, i32, i32
  }
  func.func @transform_14(%arg0: i32) -> (i32, i32, i32) {
    %c0_i32 = arith.constant 0 : i32
    %c0_i32_0 = arith.constant 0 : i32
    %c0_i32_1 = arith.constant 0 : i32
    %c0_i32_2 = arith.constant 0 : i32
    return %c0_i32, %c0_i32_0, %c0_i32_1 : i32, i32, i32
  }
  func.func @transform_15(%arg0: i32) -> (i32, i32, i32) {
    %c0_i32 = arith.constant 0 : i32
    %c0_i32_0 = arith.constant 0 : i32
    %c0_i32_1 = arith.constant 0 : i32
    %c0_i32_2 = arith.constant 0 : i32
    return %c0_i32, %c0_i32_0, %c0_i32_1 : i32, i32, i32
  }
  func.func @transform_16(%arg0: i32) -> (i32, i32, i32) {
    %c0_i32 = arith.constant 0 : i32
    %c0_i32_0 = arith.constant 0 : i32
    %c0_i32_1 = arith.constant 0 : i32
    %c0_i32_2 = arith.constant 0 : i32
    return %c0_i32, %c0_i32_0, %c0_i32_1 : i32, i32, i32
  }
  func.func @transform_17(%arg0: i32) -> (i32, i32, i32) {
    %c0_i32 = arith.constant 0 : i32
    %c0_i32_0 = arith.constant 0 : i32
    %c0_i32_1 = arith.constant 0 : i32
    %c0_i32_2 = arith.constant 0 : i32
    return %c0_i32, %c0_i32_0, %c0_i32_1 : i32, i32, i32
  }
  func.func @transform_18(%arg0: i32) -> (i32, i32, i32) {
    %c0_i32 = arith.constant 0 : i32
    %c0_i32_0 = arith.constant 0 : i32
    %c0_i32_1 = arith.constant 0 : i32
    %c0_i32_2 = arith.constant 0 : i32
    return %c0_i32, %c0_i32_0, %c0_i32_1 : i32, i32, i32
  }
  func.func @transform_19(%arg0: i32) -> (i32, i32, i32) {
    %c0_i32 = arith.constant 0 : i32
    %c0_i32_0 = arith.constant 0 : i32
    %c0_i32_1 = arith.constant 0 : i32
    %c0_i32_2 = arith.constant 0 : i32
    return %c0_i32, %c0_i32_0, %c0_i32_1 : i32, i32, i32
  }
  func.func @transform_20(%arg0: i32) -> (i32, i32) {
    %c0_i32 = arith.constant 0 : i32
    %c0_i32_0 = arith.constant 0 : i32
    %c0_i32_1 = arith.constant 0 : i32
    return %c0_i32, %c0_i32_0 : i32, i32
  }
  func.func @transform_21(%arg0: i32) -> (i32, i32) {
    %c0_i32 = arith.constant 0 : i32
    %c0_i32_0 = arith.constant 0 : i32
    %c0_i32_1 = arith.constant 0 : i32
    return %c0_i32, %c0_i32_0 : i32, i32
  }
  func.func @transform_22(%arg0: i32) -> (i32, i32) {
    %c0_i32 = arith.constant 0 : i32
    %c0_i32_0 = arith.constant 0 : i32
    return %arg0, %c0_i32 : i32, i32
  }
}

</mosaic_0001>

<bundles_post_ra>
// kernel: tpu_custom_call.1
= control target key start
LH: loop header
LB: loop body
LE: loop exit
PB: predicated region body
PF: predicated region fallthrough
CT: control target
= control target key end

     0   :  { %s4684_s0 = inlined_call_operand.vmem [shape: f32[16,16], index: 0, kind: input, shape index: {}]   ;;  %s4685_s1 = inlined_call_operand.vmem [shape: f32[16,16], index: 1, kind: input, shape index: {}]   ;;  %s4686_s2 = inlined_call_operand.vmem [shape: bf16[16,64], index: 2, kind: input, shape index: {}]   ;;  %s4687_s3 = inlined_call_operand.vmem [shape: f32[1,64], index: 3, kind: input, shape index: {}]   ;;  %s4688_s4 = inlined_call_operand.hbm [shape: f32[16,64], index: 4, kind: input, shape index: {}]   ;;  %s4689_s5 = inlined_call_operand.vmem [shape: bf16[2,64,192], index: 5, kind: input, shape index: {}]   ;;  %s4690_s6 = inlined_call_operand.hbm [shape: f32[2,1,192], index: 6, kind: input, shape index: {}]   ;;  %s4691_s7 = inlined_call_operand.vmem [shape: bf16[2,4,16,64], index: 7, kind: input, shape index: {}]   ;;  %s4692_s8 = inlined_call_operand.vmem [shape: f32[2,1,64], index: 8, kind: input, shape index: {}]   ;;  %s4693_s9 = inlined_call_operand.hbm [shape: f32[2,1,64], index: 9, kind: input, shape index: {}]   ;;  %s4694_s10 = inlined_call_operand.hbm [shape: f32[2,1,64], index: 10, kind: input, shape index: {}]   ;;  %s4695_s11 = inlined_call_operand.hbm [shape: f32[2,1,64], index: 11, kind: input, shape index: {}]   ;;  %s4696_s12 = inlined_call_operand.hbm [shape: f32[2,1,64], index: 12, kind: input, shape index: {}]   ;;  %s4697_s13 = inlined_call_operand.hbm [shape: f32[2,1,64], index: 13, kind: input, shape index: {}]   ;;  %s4698_s14 = inlined_call_operand.hbm [shape: f32[2,1,64], index: 14, kind: input, shape index: {}]   ;;  %s4699_s15 = inlined_call_operand.hbm [shape: f32[2,1,64], index: 15, kind: input, shape index: {}]   ;;  %s4700_s16 = inlined_call_operand.hbm [shape: bf16[2,64,128], index: 16, kind: input, shape index: {}]   ;;  %s4701_s17 = inlined_call_operand.hbm [shape: f32[2,1,128], index: 17, kind: input, shape index: {}]   ;;  %s4702_s18 = inlined_call_operand.vmem [shape: bf16[2,128,64], index: 18, kind: input, shape index: {}]   ;;  %s4703_s19 = inlined_call_operand.hbm [shape: f32[2,1,64], index: 19, kind: input, shape index: {}]   ;;  %s4704_s20 = inlined_call_operand.vmem [shape: bf16[64,16], index: 20, kind: input, shape index: {}]   ;;  %s4705_s21 = inlined_call_operand.vmem [shape: f32[1,16], index: 21, kind: input, shape index: {}]   ;;  %s4706_s22 = inlined_call_operand.hbm [shape: f32[16,16], index: 22, kind: output, shape index: {}]  }
   0x1   :  { %4713 = sst [smem:[#allocation31_spill]] %s4684_s0 }
   0x2   :  { %4714 = sst [smem:[#allocation32_spill]] %s4685_s1 }
   0x3   :  { %4715 = sst [smem:[#allocation33_spill]] %s4686_s2 }
   0x4   :  { %4716 = sst [smem:[#allocation34_spill]] %s4687_s3 }
   0x5   :  { %4717 = sst [smem:[#allocation35_spill]] %s4688_s4 }
   0x6   :  { %4718 = sst [smem:[#allocation36_spill]] %s4689_s5 }
   0x7   :  { %4719 = sst [smem:[#allocation37_spill]] %s4690_s6 }
   0x8   :  { %4720 = sst [smem:[#allocation38_spill]] %s4705_s21 }
   0x9   :  { %4721 = sst [smem:[#allocation39_spill]] %s4706_s22 }
   0xa   :  { %27 = vsyncpa [#allocation3], 0 }
   0xb   :  { %28 = vsyncpa [#allocation6], 0 }
   0xc   :  { %29 = vsyncpa [#allocation9], 0 }
   0xd   :  { %30 = vsyncpa [#allocation12], 0 }
   0xe   :  { %31 = vsyncpa [#allocation15], 0 }
   0xf   :  { %32 = vsyncpa [#allocation18], 0 }
  0x10   :  { %33 = vsyncpa [#allocation21], 0 }
  0x11   :  { %34 = vsyncpa [#allocation4], 0  ;;  %s3854_s3 = smov [#allocation5]   ;;  %s4722_s4 = sld [smem:[#allocation37_spill]] }
  0x12   :  { %s62_s28 = sshll.u32 %s3854_s3, 4  ;;  %s63_s28 = int_to_ptr.vmem [resolvable:$true] %s62_s28 }
  0x17   :  { %s3552_s0 = scalar_lea.hbm %s4722_s4, 64 }
  0x18   :  { %p3553_p0 = scmp.ne.s32.totalorder %s4722_s4, %s3552_s0  ;;  %p3556_p1 = scmp.lt.u32.totalorder %s3552_s0, %s4722_s4 }
  0x1a   :  { %p3558_p2 = pnand %p3556_p1, %p3553_p0 }
  0x1c   :  { %3561 = shalt.err (!%p3558_p2)
}
  0x1d   :  { %s3562_s6 = scalar_lea.vmem %s63_s28, 64  ;;  %p3567_p4 = scmp.lt.s32.totalorder %s63_s28, %s63_s28 }
  0x1e   :  { %p3563_p3 = scmp.ne.s32.totalorder %s63_s28, %s3562_s6  ;;  %p3568_p5 = scmp.lt.s32.totalorder %s3562_s6, %s3562_s6 }
  0x20   :  { %p3569_p6 = por %p3568_p5, %p3567_p4 }
  0x22   :  { %p3570_p7 = pnand %p3569_p6, %p3563_p3 }
  0x24   :  { %3573 = shalt.err (!%p3570_p7)
}
  0x25   :  { %s3855_s25 = smov 32   ;;  %s3856_s26 = smov 2  }
  0x26   :  { %68 = dma.hbm_to_vmem [thread:$0]  %s4722_s4, 64, %s63_s28, [#allocation6], %s3855_s25, %s3855_s25, %s3856_s26  }
  0x27   :  { %s3857_s3 = smov [#allocation8]   ;;  %s3858_s30 = smov [#allocation11]  }
  0x28   :  { %s90_s29 = sshll.u32 %s3857_s3, 4  ;;  %s114_s0 = sshll.u32 %s3858_s30, 4  ;;  %s91_s29 = int_to_ptr.vmem [resolvable:$true] %s90_s29  ;;  %s115_s0 = int_to_ptr.vmem [resolvable:$true] %s114_s0 }
  0x29   :  { %s3574_s5 = scalar_lea.hbm %s4694_s10, 32 }
  0x2a   :  { %p3575_p8 = scmp.ne.s32.totalorder %s4694_s10, %s3574_s5  ;;  %p3578_p9 = scmp.lt.u32.totalorder %s3574_s5, %s4694_s10 }
  0x2c   :  { %p3580_p10 = pnand %p3578_p9, %p3575_p8 }
  0x2e   :  { %3583 = shalt.err (!%p3580_p10)
}
  0x2f   :  { %s3584_s28 = scalar_lea.vmem %s91_s29, 32  ;;  %p3589_p12 = scmp.lt.s32.totalorder %s91_s29, %s91_s29 }
  0x30   :  { %p3585_p11 = scmp.ne.s32.totalorder %s91_s29, %s3584_s28  ;;  %p3590_p13 = scmp.lt.s32.totalorder %s3584_s28, %s3584_s28 }
  0x32   :  { %p3591_p0 = por %p3590_p13, %p3589_p12 }
  0x34   :  { %p3592_p1 = pnand %p3591_p0, %p3585_p11 }
  0x36   :  { %3595 = shalt.err (!%p3592_p1)
}
  0x37   :  { %s3859_s4 = smov 16   ;;  %s3860_s25 = smov 1  }
  0x38   :  { %96 = dma.hbm_to_vmem [thread:$0]  %s4694_s10, 32, %s91_s29, [#allocation9], %s3859_s4, %s3859_s4, %s3860_s25  }
  0x39   :  { %s3596_s27 = scalar_lea.hbm %s4696_s12, 32 }
  0x3a   :  { %p3597_p2 = scmp.ne.s32.totalorder %s4696_s12, %s3596_s27  ;;  %p3600_p3 = scmp.lt.u32.totalorder %s3596_s27, %s4696_s12 }
  0x3c   :  { %p3602_p4 = pnand %p3600_p3, %p3597_p2 }
  0x3e   :  { %3605 = shalt.err (!%p3602_p4)
}
  0x3f   :  { %s3606_s5 = scalar_lea.vmem %s115_s0, 32  ;;  %p3611_p6 = scmp.lt.s32.totalorder %s115_s0, %s115_s0 }
  0x40   :  { %p3607_p5 = scmp.ne.s32.totalorder %s115_s0, %s3606_s5  ;;  %p3612_p7 = scmp.lt.s32.totalorder %s3606_s5, %s3606_s5 }
  0x42   :  { %p3613_p8 = por %p3612_p7, %p3611_p6 }
  0x44   :  { %p3614_p9 = pnand %p3613_p8, %p3607_p5 }
  0x46   :  { %3617 = shalt.err (!%p3614_p9)
}
  0x47   :  { %120 = dma.hbm_to_vmem [thread:$0]  %s4696_s12, 32, %s115_s0, [#allocation12], %s3859_s4, %s3859_s4, %s3860_s25  }
  0x48   :  { %s3861_s24 = smov [#allocation14]   ;;  %s3862_s28 = smov [#allocation17]  }
  0x49   :  { %s138_s6 = sshll.u32 %s3861_s24, 4  ;;  %s162_s26 = sshll.u32 %s3862_s28, 4  ;;  %s139_s6 = int_to_ptr.vmem [resolvable:$true] %s138_s6  ;;  %s163_s26 = int_to_ptr.vmem [resolvable:$true] %s162_s26 }
  0x4a   :  { %s3618_s22 = scalar_lea.hbm %s4698_s14, 32 }
  0x4b   :  { %p3619_p10 = scmp.ne.s32.totalorder %s4698_s14, %s3618_s22  ;;  %p3622_p11 = scmp.lt.u32.totalorder %s3618_s22, %s4698_s14 }
  0x4d   :  { %p3624_p12 = pnand %p3622_p11, %p3619_p10 }
  0x4f   :  { %3627 = shalt.err (!%p3624_p12)
}
  0x50   :  { %s3628_s12 = scalar_lea.vmem %s139_s6, 32  ;;  %p3633_p0 = scmp.lt.s32.totalorder %s139_s6, %s139_s6 }
  0x51   :  { %p3629_p13 = scmp.ne.s32.totalorder %s139_s6, %s3628_s12  ;;  %p3634_p1 = scmp.lt.s32.totalorder %s3628_s12, %s3628_s12 }
  0x53   :  { %p3635_p2 = por %p3634_p1, %p3633_p0 }
  0x55   :  { %p3636_p3 = pnand %p3635_p2, %p3629_p13 }
  0x57   :  { %3639 = shalt.err (!%p3636_p3)
}
  0x58   :  { %144 = dma.hbm_to_vmem [thread:$0]  %s4698_s14, 32, %s139_s6, [#allocation15], %s3859_s4, %s3859_s4, %s3860_s25  }
  0x59   :  { %s3640_s29 = scalar_lea.hbm %s4700_s16, 1024 }
  0x5a   :  { %p3641_p4 = scmp.ne.s32.totalorder %s4700_s16, %s3640_s29  ;;  %p3644_p5 = scmp.lt.u32.totalorder %s3640_s29, %s4700_s16 }
  0x5c   :  { %p3646_p6 = pnand %p3644_p5, %p3641_p4 }
  0x5e   :  { %3649 = shalt.err (!%p3646_p6)
}
  0x5f   :  { %s3650_s22 = scalar_lea.vmem %s163_s26, 1024  ;;  %p3655_p8 = scmp.lt.s32.totalorder %s163_s26, %s163_s26 }
  0x60   :  { %p3651_p7 = scmp.ne.s32.totalorder %s163_s26, %s3650_s22  ;;  %p3656_p9 = scmp.lt.s32.totalorder %s3650_s22, %s3650_s22 }
  0x62   :  { %p3657_p10 = por %p3656_p9, %p3655_p8 }
  0x64   :  { %p3658_p11 = pnand %p3657_p10, %p3651_p7 }
  0x66   :  { %3661 = shalt.err (!%p3658_p11)
}
  0x67   :  { %s3863_s14 = smov 64   ;;  %s3864_s6 = smov 4  }
  0x68   :  { %168 = dma.hbm_to_vmem [thread:$0]  %s4700_s16, 1024, %s163_s26, [#allocation18], %s3863_s14, %s3863_s14, %s3864_s6  }
  0x69   :  { %s3865_s30 = smov [#allocation2]   ;;  %s4723_s1 = sld [smem:[#allocation35_spill]] }
  0x6a   :  { %s48_s23 = sshll.u32 %s3865_s30, 4  ;;  %s49_s23 = int_to_ptr.vmem [resolvable:$true] %s48_s23 }
  0x6f   :  { %s3662_s5 = scalar_lea.hbm %s4723_s1, 256 }
  0x70   :  { %p3663_p12 = scmp.ne.s32.totalorder %s4723_s1, %s3662_s5  ;;  %p3666_p13 = scmp.lt.u32.totalorder %s3662_s5, %s4723_s1 }
  0x72   :  { %p3668_p0 = pnand %p3666_p13, %p3663_p12 }
  0x74   :  { %3671 = shalt.err (!%p3668_p0)
}
  0x75   :  { %s3672_s2 = scalar_lea.vmem %s49_s23, 256  ;;  %p3677_p2 = scmp.lt.s32.totalorder %s49_s23, %s49_s23 }
  0x76   :  { %p3673_p1 = scmp.ne.s32.totalorder %s49_s23, %s3672_s2  ;;  %p3678_p3 = scmp.lt.s32.totalorder %s3672_s2, %s3672_s2 }
  0x78   :  { %p3679_p4 = por %p3678_p3, %p3677_p2 }
  0x7a   :  { %p3680_p5 = pnand %p3679_p4, %p3673_p1 }
  0x7c   :  { %3683 = shalt.err (!%p3680_p5)
}
  0x7d   :  { %s3866_s16 = smov 128   ;;  %s3867_s26 = smov 8  }
  0x7e   :  { %54 = dma.hbm_to_vmem [thread:$0]  %s4723_s1, 256, %s49_s23, [#allocation3], %s3866_s16, %s3866_s16, %s3867_s26  }
  0x7f   :  { %s3868_s6 = smov [#allocation7]   ;;  %s3869_s3 = smov [#allocation10]  }
  0x80   :  { %s78_s27 = sshll.u32 %s3868_s6, 4  ;;  %s102_s30 = sshll.u32 %s3869_s3, 4  ;;  %s79_s27 = int_to_ptr.vmem [resolvable:$true] %s78_s27  ;;  %s4082_s30 = int_to_ptr.vmem [resolvable:$true] %s102_s30 }
  0x81   :  { %s3684_s5 = scalar_lea.hbm %s4693_s9, 32 }
  0x82   :  { %p3685_p6 = scmp.ne.s32.totalorder %s4693_s9, %s3684_s5  ;;  %p3688_p7 = scmp.lt.u32.totalorder %s3684_s5, %s4693_s9 }
  0x84   :  { %p3690_p8 = pnand %p3688_p7, %p3685_p6 }
  0x86   :  { %3693 = shalt.err (!%p3690_p8)
}
  0x87   :  { %s3694_s23 = scalar_lea.vmem %s79_s27, 32  ;;  %p3699_p10 = scmp.lt.s32.totalorder %s79_s27, %s79_s27 }
  0x88   :  { %p3695_p9 = scmp.ne.s32.totalorder %s79_s27, %s3694_s23  ;;  %p3700_p11 = scmp.lt.s32.totalorder %s3694_s23, %s3694_s23 }
  0x8a   :  { %p3701_p12 = por %p3700_p11, %p3699_p10 }
  0x8c   :  { %p3702_p13 = pnand %p3701_p12, %p3695_p9 }
  0x8e   :  { %3705 = shalt.err (!%p3702_p13)
}
  0x8f   :  { %84 = dma.hbm_to_vmem [thread:$0]  %s4693_s9, 32, %s79_s27, [#allocation6], %s3859_s4, %s3859_s4, %s3860_s25  }
  0x90   :  { %s3706_s6 = scalar_lea.hbm %s4695_s11, 32 }
  0x91   :  { %p3707_p0 = scmp.ne.s32.totalorder %s4695_s11, %s3706_s6  ;;  %p3710_p1 = scmp.lt.u32.totalorder %s3706_s6, %s4695_s11 }
  0x93   :  { %p3712_p2 = pnand %p3710_p1, %p3707_p0 }
  0x95   :  { %3715 = shalt.err (!%p3712_p2)
}
  0x96   :  { %s3716_s10 = scalar_lea.vmem %s4082_s30, 32  ;;  %p3721_p4 = scmp.lt.s32.totalorder %s4082_s30, %s4082_s30 }
  0x97   :  { %p3717_p3 = scmp.ne.s32.totalorder %s4082_s30, %s3716_s10  ;;  %p3722_p5 = scmp.lt.s32.totalorder %s3716_s10, %s3716_s10 }
  0x99   :  { %p3723_p6 = por %p3722_p5, %p3721_p4 }
  0x9b   :  { %p3724_p7 = pnand %p3723_p6, %p3717_p3 }
  0x9d   :  { %3727 = shalt.err (!%p3724_p7)
}
  0x9e   :  { %108 = dma.hbm_to_vmem [thread:$0]  %s4695_s11, 32, %s4082_s30, [#allocation9], %s3859_s4, %s3859_s4, %s3860_s25  }
  0x9f   :  { %s3870_s29 = smov [#allocation13]   ;;  %s3871_s28 = smov [#allocation16]  }
  0xa0   :  { %s126_s24 = sshll.u32 %s3870_s29, 4  ;;  %s150_s23 = sshll.u32 %s3871_s28, 4  ;;  %s127_s24 = int_to_ptr.vmem [resolvable:$true] %s126_s24  ;;  %s4119_s23 = int_to_ptr.vmem [resolvable:$true] %s150_s23 }
  0xa1   :  { %s3728_s21 = scalar_lea.hbm %s4697_s13, 32 }
  0xa2   :  { %p3729_p8 = scmp.ne.s32.totalorder %s4697_s13, %s3728_s21  ;;  %p3732_p9 = scmp.lt.u32.totalorder %s3728_s21, %s4697_s13 }
  0xa4   :  { %p3734_p10 = pnand %p3732_p9, %p3729_p8 }
  0xa6   :  { %3737 = shalt.err (!%p3734_p10)
}
  0xa7   :  { %s3738_s11 = scalar_lea.vmem %s127_s24, 32  ;;  %p3743_p12 = scmp.lt.s32.totalorder %s127_s24, %s127_s24 }
  0xa8   :  { %p3739_p11 = scmp.ne.s32.totalorder %s127_s24, %s3738_s11  ;;  %p3744_p13 = scmp.lt.s32.totalorder %s3738_s11, %s3738_s11 }
  0xaa   :  { %p3745_p0 = por %p3744_p13, %p3743_p12 }
  0xac   :  { %p3746_p1 = pnand %p3745_p0, %p3739_p11 }
  0xae   :  { %3749 = shalt.err (!%p3746_p1)
}
  0xaf   :  { %132 = dma.hbm_to_vmem [thread:$0]  %s4697_s13, 32, %s127_s24, [#allocation12], %s3859_s4, %s3859_s4, %s3860_s25  }
  0xb0   :  { %s3750_s9 = scalar_lea.hbm %s4699_s15, 32 }
  0xb1   :  { %p3751_p2 = scmp.ne.s32.totalorder %s4699_s15, %s3750_s9  ;;  %p3754_p3 = scmp.lt.u32.totalorder %s3750_s9, %s4699_s15 }
  0xb3   :  { %p3756_p4 = pnand %p3754_p3, %p3751_p2 }
  0xb5   :  { %3759 = shalt.err (!%p3756_p4)
}
  0xb6   :  { %s3760_s2 = scalar_lea.vmem %s4119_s23, 32  ;;  %p3765_p6 = scmp.lt.s32.totalorder %s4119_s23, %s4119_s23 }
  0xb7   :  { %p3761_p5 = scmp.ne.s32.totalorder %s4119_s23, %s3760_s2  ;;  %p3766_p7 = scmp.lt.s32.totalorder %s3760_s2, %s3760_s2 }
  0xb9   :  { %p3767_p8 = por %p3766_p7, %p3765_p6 }
  0xbb   :  { %p3768_p9 = pnand %p3767_p8, %p3761_p5 }
  0xbd   :  { %3771 = shalt.err (!%p3768_p9)
}
  0xbe   :  { %156 = dma.hbm_to_vmem [thread:$0]  %s4699_s15, 32, %s4119_s23, [#allocation15], %s3859_s4, %s3859_s4, %s3860_s25  }
  0xbf   :  { %s3872_s21 = smov [#allocation19]   ;;  %s3873_s6 = smov [#allocation20]  }
  0xc0   :  { %s174_s22 = sshll.u32 %s3872_s21, 4  ;;  %s188_s3 = sshll.u32 %s3873_s6, 4  ;;  %s175_s22 = int_to_ptr.vmem [resolvable:$true] %s174_s22  ;;  %s4156_s3 = int_to_ptr.vmem [resolvable:$true] %s188_s3 }
  0xc1   :  { %s3772_s30 = scalar_lea.hbm %s4701_s17, 32 }
  0xc2   :  { %p3773_p10 = scmp.ne.s32.totalorder %s4701_s17, %s3772_s30  ;;  %p3776_p11 = scmp.lt.u32.totalorder %s3772_s30, %s4701_s17 }
  0xc4   :  { %p3778_p12 = pnand %p3776_p11, %p3773_p10 }
  0xc6   :  { %3781 = shalt.err (!%p3778_p12)
}
  0xc7   :  { %s3782_s15 = scalar_lea.vmem %s175_s22, 32  ;;  %p3787_p0 = scmp.lt.s32.totalorder %s175_s22, %s175_s22 }
  0xc8   :  { %p3783_p13 = scmp.ne.s32.totalorder %s175_s22, %s3782_s15  ;;  %p3788_p1 = scmp.lt.s32.totalorder %s3782_s15, %s3782_s15 }
  0xca   :  { %p3789_p2 = por %p3788_p1, %p3787_p0 }
  0xcc   :  { %p3790_p3 = pnand %p3789_p2, %p3783_p13 }
  0xce   :  { %3793 = shalt.err (!%p3790_p3)
}
  0xcf   :  { %180 = dma.hbm_to_vmem [thread:$0]  %s4701_s17, 32, %s175_s22, [#allocation18], %s3859_s4, %s3859_s4, %s3860_s25  }
  0xd0   :  { %s3794_s1 = scalar_lea.hbm %s4703_s19, 32 }
  0xd1   :  { %p3795_p4 = scmp.ne.s32.totalorder %s4703_s19, %s3794_s1  ;;  %p3798_p5 = scmp.lt.u32.totalorder %s3794_s1, %s4703_s19 }
  0xd3   :  { %p3800_p6 = pnand %p3798_p5, %p3795_p4 }
  0xd5   :  { %3803 = shalt.err (!%p3800_p6)
}
  0xd6   :  { %s3804_s6 = scalar_lea.vmem %s4156_s3, 32  ;;  %p3809_p8 = scmp.lt.s32.totalorder %s4156_s3, %s4156_s3 }
  0xd7   :  { %p3805_p7 = scmp.ne.s32.totalorder %s4156_s3, %s3804_s6  ;;  %p3810_p9 = scmp.lt.s32.totalorder %s3804_s6, %s3804_s6 }
  0xd9   :  { %p3811_p10 = por %p3810_p9, %p3809_p8 }
  0xdb   :  { %p3812_p11 = pnand %p3811_p10, %p3805_p7 }
  0xdd   :  { %3815 = shalt.err (!%p3812_p11)
}
  0xde   :  { %194 = dma.hbm_to_vmem [thread:$0]  %s4703_s19, 32, %s4156_s3, [#allocation21], %s3859_s4, %s3859_s4, %s3860_s25  }
  0xdf   :  { %3838 = dma.done.wait [#allocation3], 256  }
  0xe0   :  { %3839 = vsyncadd [#allocation3], 4294967040 }
  0xe1   :  { %3840 = dma.done.wait [#allocation6], 96  }
  0xe2   :  { %3841 = vsyncadd [#allocation6], 4294967200 }
  0xe3   :  { %3842 = dma.done.wait [#allocation9], 64  }
  0xe4   :  { %3843 = vsyncadd [#allocation9], 4294967232 }
  0xe5   :  { %3844 = dma.done.wait [#allocation12], 64  }
  0xe6   :  { %3845 = vsyncadd [#allocation12], 4294967232 }
  0xe7   :  { %3846 = dma.done.wait [#allocation15], 64  }
  0xe8   :  { %3847 = vsyncadd [#allocation15], 4294967232 }
  0xe9   :  { %3848 = dma.done.wait [#allocation18], 1056  }
  0xea   :  { %3849 = vsyncadd [#allocation18], 4294966240 }
  0xeb   :  { %3850 = dma.done.wait [#allocation21], 32  }
  0xec   :  { %3851 = vsyncadd [#allocation21], 4294967264  ;;  %v3874_v0 = vmov 0.0   ;;  %vm3875_vm0 = vmmov 0   ;;  %s4724_s25 = sld [smem:[#allocation33_spill]]  ;;  %s4725_s11 = sld [smem:[#allocation31_spill]]  ;;  %v316_v26 = vlaneseq }
  0xed   :  { %3088 = vmatprep.subr.bf16.mxu0 %v3874_v0  ;;  %3090 = vmatprep.mubr.msk.bf16.mxu0 %vm3875_vm0, %v3874_v0  ;;  %vm254_vm1 = vcmask 130048   ;;  %s4726_s9 = sld [smem:[#allocation36_spill]]  ;;  %v3876_v13 = vmov 0   ;;  %s4727_s3 = sld [smem:[#allocation34_spill]]  ;;  %v299_v18 = vld [vmem:[#allocation2] sm:$0xff]  ;;  %v300_v20 = vld [vmem:[#allocation2 + $0x8] sm:$0xff] }
  0xee   :  { %402 = vmatprep.mubr.bf16.mxu1 %v3876_v13  ;;  %vm366_vm2 = vcmask 523264   ;;  %v4247_v27 = vshrl.u32 %v316_v26, 7  ;;  %v314_v29 = vld [vmem:[#allocation5] sm:$0x3]  ;;  %s3877_s12 = smov 80   ;;  %s3879_s30 = smov 96  }
  0xef   :  { %s4728_s10 = sld [smem:[#allocation32_spill]]  ;;  %s4729_s17 = sld [smem:[#allocation38_spill]] }
  0xf0   :  { %v318_v28 = vsub.s32 0, %v4247_v27  ;;  %v322_v30 = vsub.s32 1, %v4247_v27 }
  0xf2   :  { %v3401_v1 = vld [vmem:[%s4724_s25] sm:$0xff]   ;;  %v237_v3 = vld [vmem:[%s4725_s11 + $0x8] sm:$0xff]  ;;  %v319_v31 = vrot.slane %v314_v29, %v318_v28  ;;  %v323_v33 = vrot.slane %v314_v29, %v322_v30 }
  0xf3   :  { %v236_v2 = vld [vmem:[%s4725_s11] sm:$0xff]  ;;  %3089 = vmatpush3.bf16.msra.mxu0 %v3401_v1  ;;  %v3405_v7 = vld [vmem:[%s4726_s9 + $0x14] ss:$8 sps:$4 sm:$0xff]   ;;  %v3407_v8 = vld [vmem:[%s4726_s9 + $0x10] ss:$8 sps:$4 sm:$0xff]   ;;  %s3878_s11 = smov 112  }
  0xf4   :  { %v238_v4 = vpack.c.bf16 %v237_v3, %v236_v2  ;;  %v3402_v5 = vld [vmem:[%s4726_s9 + $0x4] ss:$8 sps:$4 sm:$0xff]   ;;  %v3404_v6 = vld [vmem:[%s4726_s9] ss:$8 sps:$4 sm:$0xff]   ;;  %3094 = vmatprep.subr.bf16.mxu0 %v3874_v0  ;;  %v3411_v11 = vld [vmem:[%s4726_s9 + $0x34] ss:$8 sps:$4 sm:$0xff]  }
  0xf5   :  { %370 = vmatprep.subr.bf16.mxu1 %v3402_v5  ;;  %v3408_v9 = vld [vmem:[%s4726_s9 + $0x24] ss:$8 sps:$4 sm:$0xff]   ;;  %v3410_v10 = vld [vmem:[%s4726_s9 + $0x20] ss:$8 sps:$4 sm:$0xff]   ;;  %v3413_v12 = vld [vmem:[%s4726_s9 + $0x30] ss:$8 sps:$4 sm:$0xff]  }
  0xf6   :  { %3091 = vmatmul.mubr.msk.bf16.vlgmr.msra.gmra.mrb[0].mxu0 %vm254_vm1, %v238_v4  ;;  %371 = vmatpush1.bf16.msra.mxu1 %v3404_v6  ;;  %v2867_v14 = vld [vmem:[%s4727_s3] ss:$0 sm:$0xff] }
  0xf7   :  { %372 = vmatprep.subr.bf16.mxu1 %v3405_v7  ;;  %3096 = vmatprep.mubr.msk.bf16.mxu0 %vm3875_vm0, %v3874_v0  ;;  %v4288_v3 = vld [vmem:[%s4728_s10] sm:$0xff]  ;;  %v4293_v7 = vld [vmem:[%s4728_s10 + $0x8] sm:$0xff] }
  0xfa   :  { %373 = vmatpush1.bf16.msra.mxu1 %v3407_v8 }
  0xfb   :  { %374 = vmatprep.subr.bf16.mxu1 %v3408_v9 }
  0xfe   :  { %375 = vmatpush1.bf16.msra.mxu1 %v3410_v10 }
  0xff   :  { %376 = vmatprep.subr.bf16.mxu1 %v3411_v11 }
 0x102   :  { %377 = vmatpush1.bf16.msra.mxu1 %v3413_v12 }
 0x103   :  { %3106 = vmatprep.subr.bf16.mxu1 %v3874_v0 }
 0x1c9   :  { %v292_v15 = vpop.f32.mrb[0].mxu0 }
 0x1ca   :  { %v293_v16 = vadd.f32 %v2867_v14, %v292_v15  ;;  %v3092_v17 = vpop.f32.mrb[1].mxu0 }
 0x1cb   :  { %v295_v19 = vpop.f32.mrb[2].mxu0 }
 0x1cc   :  { %v296_v21 = vadd.f32 %v2867_v14, %v295_v19  ;;  %v3093_v22 = vpop.f32.mrb[3].mxu0  ;;  %v4238_v23 = vadd.f32 %v299_v18, %v293_v16 }
 0x1ce   :  { %v4240_v24 = vadd.f32 %v300_v20, %v296_v21 }
 0x1d0   :  { %v305_v25 = vpack.c.bf16 %v4240_v24, %v4238_v23 }
 0x1d2   :  { %2878 = vmatmul.mubr.msk.bf16.vlgmr.msra.gmra.mrb[0].mxu1 %vm366_vm2, %v305_v25 }
 0x1d3   :  { %3108 = vmatprep.mubr.msk.bf16.mxu1 %vm3875_vm0, %v3874_v0 }
 0x2a5   :  { %v404_v32 = vpop.f32.mrb[0].mxu1 }
 0x2a6   :  { %v406_v34 = vpop.f32.mrb[1].mxu1  ;;  %v405_v36 = vadd.f32 %v404_v32, %v319_v31 }
 0x2a7   :  { %v408_v35 = vpop.f32.mrb[2].mxu1  ;;  %v407_v39 = vadd.f32 %v406_v34, %v323_v33 }
 0x2a8   :  { %v409_v37 = vadd.f32 %v408_v35, %v319_v31  ;;  %v410_v38 = vpop.f32.mrb[3].mxu1 }
 0x2a9   :  { %v411_v40 = vadd.f32 %v410_v38, %v323_v33 }
 0x2aa   :  { %v3351_v41 = vpack.i.bf16 %v409_v37, %v405_v36  ;;  %v433_v42 = vpack.c.bf16 %v409_v37, %v405_v36 }
 0x2ab   :  { %v457_v43 = vpack.c.bf16 %v411_v40, %v407_v39  ;;  %v4255_v44 = vpack.i.bf16 %v411_v40, %v407_v39 }
 0x2ac   :  { %3352 = vrot.lane.b32.xlu1 %v3351_v41, %s3877_s12  ;;  %3342 = vrot.lane.b32.xlu0 %v3351_v41, %s3878_s11 }
 0x2b0   :  { %3347 = vrot.lane.b32.xlu0 %v3351_v41, %s3879_s30  ;;  %462 = vrot.lane.b32.xlu1 %v433_v42, %s3863_s14 }
 0x31e   :  { %v3353_v45 = vpop.permute.xlu1 %3352  ;;  %v3343_v46 = vpop.permute.xlu0 %3342 }
 0x31f   :  { %v3345_v47 = vunpack.i.h.bf16 %v3343_v46  ;;  %v3344_v48 = vunpack.i.l.bf16 %v3343_v46  ;;  %v3355_v49 = vunpack.i.h.bf16 %v3353_v45  ;;  %v3354_v50 = vunpack.i.l.bf16 %v3353_v45 }
 0x321   :  { %v434_v51 = vpack.c.bf16 %v3345_v47, %v3344_v48  ;;  %v436_v57 = vpack.c.bf16 %v3355_v49, %v3354_v50 }
 0x322   :  { %v3348_v52 = vpop.permute.xlu0 %3347  ;;  %v463_v53 = vpop.permute.xlu1 %462 }
 0x323   :  { %v3350_v54 = vunpack.i.h.bf16 %v3348_v52  ;;  %v3349_v55 = vunpack.i.l.bf16 %v3348_v52  ;;  %v468_v56 = vsel %vm254_vm1, %v463_v53, 0  ;;  %512 = vrot.lane.b32.xlu0 %v434_v51, %s3863_s14 }
 0x324   :  { %3095 = vmatpush3.bf16.xpose.msra.mxu0 %v468_v56 }
 0x325   :  { %v435_v58 = vpack.c.bf16 %v3350_v54, %v3349_v55  ;;  %3100 = vmatprep.subr.bf16.mxu0 %v3874_v0 }
 0x327   :  { %612 = vrot.lane.b32.xlu0 %v436_v57, %s3863_s14  ;;  %562 = vrot.lane.b32.xlu1 %v435_v58, %s3863_s14 }
 0x32b   :  { %3097 = vmatmul.mubr.msk.bf16.vlgmr.msra.gmra.mrb[4].mxu0 %vm254_vm1, %v433_v42 }
 0x32c   :  { %3102 = vmatprep.mubr.msk.bf16.mxu0 %vm3875_vm0, %v3874_v0 }
 0x395   :  { %v513_v59 = vpop.permute.xlu0 %512 }
 0x396   :  { %v518_v60 = vsel %vm254_vm1, %v513_v59, 0 }
 0x397   :  { %3101 = vmatpush3.bf16.xpose.msra.mxu0 %v518_v60 }
 0x398   :  { %3112 = vmatprep.subr.bf16.mxu0 %v3874_v0 }
 0x399   :  { %v563_v61 = vpop.permute.xlu1 %562  ;;  %v613_v63 = vpop.permute.xlu0 %612 }
 0x39a   :  { %v568_v62 = vsel %vm254_vm1, %v563_v61, 0  ;;  %v618_v1 = vsel %vm254_vm1, %v613_v63, 0 }
 0x39b   :  { %3107 = vmatpush3.bf16.xpose.msra.mxu1 %v568_v62 }
 0x39c   :  { %3118 = vmatprep.subr.bf16.mxu1 %v3874_v0 }
 0x39e   :  { %3103 = vmatmul.mubr.msk.bf16.vlgmr.msra.gmra.mrb[8].mxu0 %vm254_vm1, %v434_v51 }
 0x39f   :  { %3113 = vmatpush3.bf16.xpose.msra.mxu0 %v618_v1  ;;  %3114 = vmatprep.mubr.msk.bf16.mxu0 %vm3875_vm0, %v3874_v0 }
 0x3a0   :  { %3124 = vmatprep.subr.bf16.mxu0 %v3874_v0 }
 0x3a2   :  { %3109 = vmatmul.mubr.msk.bf16.vlgmr.msra.gmra.mrb[4].mxu1 %vm254_vm1, %v435_v58 }
 0x3a3   :  { %3119 = vmatpush3.bf16.msra.mxu1 %v457_v43  ;;  %3120 = vmatprep.mubr.msk.bf16.mxu1 %vm3875_vm0, %v3874_v0 }
 0x3a4   :  { %3130 = vmatprep.subr.bf16.mxu1 %v3874_v0 }
 0x3a6   :  { %3115 = vmatmul.mubr.msk.bf16.vlgmr.msra.gmra.mrb[12].mxu0 %vm254_vm1, %v436_v57 }
 0x3a7   :  { %3126 = vmatprep.mubr.msk.bf16.mxu0 %vm3875_vm0, %v3874_v0 }
 0x3fe   :  { %v504_v2 = vpop.f32.mrb[4].mxu0 }
 0x3ff   :  { %v661_v4 = vmul.f32 0.25, %v504_v2  ;;  %v3098_v5 = vpop.f32.mrb[5].mxu0 }
 0x400   :  { %v507_v6 = vpop.f32.mrb[6].mxu0 }
 0x401   :  { %v662_v8 = vmul.f32 0.25, %v507_v6  ;;  %v3099_v9 = vpop.f32.mrb[7].mxu0  ;;  %v669_v10 = vadd.f32 %v661_v4, %v4288_v3 }
 0x403   :  { %v677_v11 = vsel %vm254_vm1, %v669_v10, -inf  ;;  %v670_v12 = vadd.f32 %v662_v8, %v4293_v7 }
 0x404   :  { %678 = vmax.xlane.f32.xlu1 %v677_v11 }
 0x405   :  { %v680_v14 = vsel %vm254_vm1, %v670_v12, -inf }
 0x406   :  { %681 = vmax.xlane.f32.xlu0 %v680_v14 }
 0x471   :  { %v554_v15 = vpop.f32.mrb[8].mxu0 }
 0x472   :  { %v663_v16 = vmul.f32 0.25, %v554_v15  ;;  %v3104_v17 = vpop.f32.mrb[9].mxu0 }
 0x473   :  { %v557_v18 = vpop.f32.mrb[10].mxu0 }
 0x474   :  { %v664_v19 = vmul.f32 0.25, %v557_v18  ;;  %v3105_v20 = vpop.f32.mrb[11].mxu0  ;;  %v671_v21 = vadd.f32 %v663_v16, %v4288_v3 }
 0x475   :  { %v604_v22 = vpop.f32.mrb[4].mxu1 }
 0x476   :  { %v665_v25 = vmul.f32 0.25, %v604_v22  ;;  %v3110_v26 = vpop.f32.mrb[5].mxu1  ;;  %v683_v29 = vsel %vm254_vm1, %v671_v21, -inf  ;;  %v672_v31 = vadd.f32 %v664_v19, %v4293_v7 }
 0x477   :  { %v607_v32 = vpop.f32.mrb[6].mxu1  ;;  %684 = vmax.xlane.f32.xlu0 %v683_v29 }
 0x478   :  { %v666_v33 = vmul.f32 0.25, %v607_v32  ;;  %v3111_v34 = vpop.f32.mrb[7].mxu1  ;;  %v686_v35 = vsel %vm254_vm1, %v672_v31, -inf  ;;  %v673_v36 = vadd.f32 %v665_v25, %v4288_v3 }
 0x479   :  { %687 = vmax.xlane.f32.xlu1 %v686_v35  ;;  %v654_v37 = vpop.f32.mrb[12].mxu0 }
 0x47a   :  { %v667_v38 = vmul.f32 0.25, %v654_v37  ;;  %v3116_v39 = vpop.f32.mrb[13].mxu0  ;;  %v689_v40 = vsel %vm254_vm1, %v673_v36, -inf  ;;  %v674_v41 = vadd.f32 %v666_v33, %v4293_v7 }
 0x47b   :  { %690 = vmax.xlane.f32.xlu0 %v689_v40  ;;  %v657_v42 = vpop.f32.mrb[14].mxu0 }
 0x47c   :  { %v668_v43 = vmul.f32 0.25, %v657_v42  ;;  %v3117_v45 = vpop.f32.mrb[15].mxu0  ;;  %v692_v46 = vsel %vm254_vm1, %v674_v41, -inf  ;;  %v675_v47 = vadd.f32 %v667_v38, %v4288_v3 }
 0x47d   :  { %693 = vmax.xlane.f32.xlu1 %v692_v46 }
 0x47e   :  { %v695_v48 = vsel %vm254_vm1, %v675_v47, -inf  ;;  %v4310_v49 = vadd.f32 %v668_v43, %v4293_v7 }
 0x47f   :  { %696 = vmax.xlane.f32.xlu0 %v695_v48 }
 0x480   :  { %v698_v50 = vsel %vm254_vm1, %v4310_v49, -inf }
 0x481   :  { %699 = vmax.xlane.f32.xlu1 %v698_v50 }
 0x491   :  { %v679_v51 = vpop.xlane.xlu1 %678 }
 0x492   :  { %v701_v52 = vsub.f32 %v669_v10, %v679_v51 }
 0x493   :  { %v682_v53 = vpop.xlane.xlu0 %681 }
 0x494   :  { %v709_v54 = vmul.f32 1.442695, %v701_v52  ;;  %v702_v55 = vsub.f32 %v670_v12, %v682_v53 }
 0x496   :  { %3462 = vpow2.f32 %v709_v54  ;;  %v711_v56 = vmul.f32 1.442695, %v702_v55 }
 0x498   :  { %3464 = vpow2.f32 %v711_v56 }
 0x4a0   :  { %v3463_v57 = vpop.eup %3462 }
 0x4a1   :  { %v725_v58 = vsel %vm254_vm1, %v3463_v57, 0.0 }
 0x4a2   :  { %v3465_v59 = vpop.eup %3464  ;;  %726 = vadd.xlane.f32.xlu0 %v725_v58 }
 0x4a3   :  { %v728_v60 = vsel %vm254_vm1, %v3465_v59, 0.0 }
 0x4a4   :  { %729 = vadd.xlane.f32.xlu1 %v728_v60 }
 0x504   :  { %v685_v61 = vpop.xlane.xlu0 %684 }
 0x505   :  { %v703_v62 = vsub.f32 %v671_v21, %v685_v61 }
 0x506   :  { %v688_v63 = vpop.xlane.xlu1 %687 }
 0x507   :  { %v713_v1 = vmul.f32 1.442695, %v703_v62  ;;  %v704_v2 = vsub.f32 %v672_v31, %v688_v63 }
 0x508   :  { %v691_v4 = vpop.xlane.xlu0 %690 }
 0x509   :  { %3466 = vpow2.f32 %v713_v1  ;;  %v715_v5 = vmul.f32 1.442695, %v704_v2  ;;  %v705_v6 = vsub.f32 %v673_v36, %v691_v4  ;;  %v3414_v2 = vld [vmem:[%s4691_s7] sm:$0xff]  }
 0x50a   :  { %v694_v8 = vpop.xlane.xlu1 %693 }
 0x50b   :  { %3468 = vpow2.f32 %v715_v5  ;;  %v717_v9 = vmul.f32 1.442695, %v705_v6  ;;  %v706_v10 = vsub.f32 %v674_v41, %v694_v8 }
 0x50c   :  { %v697_v11 = vpop.xlane.xlu0 %696 }
 0x50d   :  { %3470 = vpow2.f32 %v717_v9  ;;  %v719_v12 = vmul.f32 1.442695, %v706_v10  ;;  %v707_v14 = vsub.f32 %v675_v47, %v697_v11 }
 0x50e   :  { %v700_v31 = vpop.xlane.xlu1 %699 }
 0x50f   :  { %3472 = vpow2.f32 %v719_v12  ;;  %v721_v15 = vmul.f32 1.442695, %v707_v14  ;;  %v708_v35 = vsub.f32 %v4310_v49, %v700_v31 }
 0x511   :  { %3474 = vpow2.f32 %v721_v15  ;;  %v723_v39 = vmul.f32 1.442695, %v708_v35 }
 0x513   :  { %v3467_v16 = vpop.eup %3466 }
 0x514   :  { %v731_v17 = vsel %vm254_vm1, %v3467_v16, 0.0 }
 0x515   :  { %v3469_v18 = vpop.eup %3468  ;;  %732 = vadd.xlane.f32.xlu0 %v731_v17  ;;  %v3415_v17 = vld [vmem:[%s4691_s7 + $0x8] sm:$0xff]  }
 0x516   :  { %v734_v19 = vsel %vm254_vm1, %v3469_v18, 0.0 }
 0x517   :  { %v3471_v20 = vpop.eup %3470  ;;  %735 = vadd.xlane.f32.xlu1 %v734_v19 }
 0x518   :  { %v737_v21 = vsel %vm254_vm1, %v3471_v20, 0.0 }
 0x519   :  { %v3473_v22 = vpop.eup %3472  ;;  %738 = vadd.xlane.f32.xlu0 %v737_v21  ;;  %v3416_v21 = vld [vmem:[%s4691_s7 + $0x10] sm:$0xff]  }
 0x51a   :  { %v740_v25 = vsel %vm254_vm1, %v3473_v22, 0.0 }
 0x51b   :  { %v4320_v26 = vpop.eup %3474  ;;  %741 = vadd.xlane.f32.xlu1 %v740_v25 }
 0x51c   :  { %v743_v29 = vsel %vm254_vm1, %v4320_v26, 0.0 }
 0x51d   :  { %744 = vadd.xlane.f32.xlu0 %v743_v29 }
 0x52c   :  { %3362 = vrot.lane.b32.xlu1 %v4255_v44, %s3879_s30 }
 0x52f   :  { %v727_v32 = vpop.xlane.xlu0 %726 }
 0x530   :  { %3476 = vrcp.f32 %v727_v32 }
 0x531   :  { %v730_v33 = vpop.xlane.xlu1 %729 }
 0x532   :  { %3478 = vrcp.f32 %v730_v33  ;;  %v3417_v33 = vld [vmem:[%s4691_s7 + $0x18] sm:$0xff]  }
 0x533   :  { %3357 = vrot.lane.b32.xlu0 %v4255_v44, %s3878_s11  ;;  %3480 = vpow2.f32 %v723_v39 }
 0x53a   :  { %v3477_v34 = vpop.eup %3476 }
 0x53b   :  { %v757_v37 = vmul.f32 %v3477_v34, %v3463_v57 }
 0x53c   :  { %v3479_v36 = vpop.eup %3478 }
 0x53d   :  { %v758_v38 = vmul.f32 %v3479_v36, %v3465_v59  ;;  %v3481_v41 = vpop.eup %3480 }
 0x53e   :  { %v746_v42 = vsel %vm254_vm1, %v3481_v41, 0.0 }
 0x53f   :  { %v765_v40 = vpack.c.bf16 %v758_v38, %v757_v37 }
 0x541   :  { %3121 = vmatmul.mubr.msk.bf16.vlgmr.msra.gmra.mrb[8].mxu1 %vm254_vm1, %v765_v40 }
 0x542   :  { %3132 = vmatprep.mubr.msk.bf16.mxu1 %vm3875_vm0, %v3874_v0 }
 0x550   :  { %747 = vadd.xlane.f32.xlu1 %v746_v42 }
 0x561   :  { %3367 = vrot.lane.b32.xlu1 %v4255_v44, %s3877_s12 }
 0x5a2   :  { %v733_v43 = vpop.xlane.xlu0 %732 }
 0x5a3   :  { %3482 = vrcp.f32 %v733_v43 }
 0x5a4   :  { %v736_v45 = vpop.xlane.xlu1 %735 }
 0x5a5   :  { %3484 = vrcp.f32 %v736_v45 }
 0x5a6   :  { %v739_v46 = vpop.xlane.xlu0 %738 }
 0x5a7   :  { %3486 = vrcp.f32 %v739_v46 }
 0x5a8   :  { %v742_v47 = vpop.xlane.xlu1 %741 }
 0x5a9   :  { %3488 = vrcp.f32 %v742_v47 }
 0x5aa   :  { %v745_v48 = vpop.xlane.xlu0 %744 }
 0x5ab   :  { %3490 = vrcp.f32 %v745_v48 }
 0x5ac   :  { %v3363_v49 = vpop.permute.xlu1 %3362 }
 0x5ad   :  { %v3365_v50 = vunpack.i.h.bf16 %v3363_v49  ;;  %v3364_v51 = vunpack.i.l.bf16 %v3363_v49  ;;  %v3483_v52 = vpop.eup %3482 }
 0x5ae   :  { %v3358_v53 = vpop.permute.xlu0 %3357  ;;  %v759_v60 = vmul.f32 %v3483_v52, %v3467_v16 }
 0x5af   :  { %v3485_v54 = vpop.eup %3484  ;;  %v459_v55 = vpack.c.bf16 %v3365_v50, %v3364_v51  ;;  %v3360_v56 = vunpack.i.h.bf16 %v3358_v53  ;;  %v3359_v57 = vunpack.i.l.bf16 %v3358_v53 }
 0x5b0   :  { %v760_v58 = vmul.f32 %v3485_v54, %v3469_v18 }
 0x5b1   :  { %v3487_v44 = vpop.eup %3486  ;;  %v458_v59 = vpack.c.bf16 %v3360_v56, %v3359_v57  ;;  %3131 = vmatpush3.bf16.msra.mxu1 %v459_v55 }
 0x5b2   :  { %3142 = vmatprep.subr.bf16.mxu1 %v3874_v0  ;;  %v761_v62 = vmul.f32 %v3487_v44, %v3471_v20  ;;  %v766_v1 = vpack.c.bf16 %v760_v58, %v759_v60 }
 0x5b3   :  { %v3489_v61 = vpop.eup %3488  ;;  %3125 = vmatpush3.bf16.msra.mxu0 %v458_v59 }
 0x5b4   :  { %v762_v63 = vmul.f32 %v3489_v61, %v3473_v22  ;;  %3136 = vmatprep.subr.bf16.mxu0 %v3874_v0 }
 0x5b5   :  { %v3491_v11 = vpop.eup %3490 }
 0x5b6   :  { %3127 = vmatmul.mubr.msk.bf16.vlgmr.msra.gmra.mrb[16].mxu0 %vm254_vm1, %v766_v1  ;;  %v767_v4 = vpack.c.bf16 %v762_v63, %v761_v62  ;;  %v763_v14 = vmul.f32 %v3491_v11, %v4320_v26 }
 0x5b7   :  { %3138 = vmatprep.mubr.msk.bf16.mxu0 %vm3875_vm0, %v3874_v0 }
 0x5b8   :  { %3133 = vmatmul.mubr.msk.bf16.vlgmr.msra.gmra.mrb[12].mxu1 %vm254_vm1, %v767_v4 }
 0x5b9   :  { %3143 = vmatpush3.bf16.msra.mxu1 %v3414_v2  ;;  %3144 = vmatprep.mubr.msk.bf16.mxu1 %vm3875_vm0, %v3874_v0 }
 0x5ba   :  { %3154 = vmatprep.subr.bf16.mxu1 %v3874_v0 }
 0x5dd   :  { %v748_v5 = vpop.xlane.xlu1 %747 }
 0x5de   :  { %3492 = vrcp.f32 %v748_v5 }
 0x5e1   :  { %v3368_v6 = vpop.permute.xlu1 %3367 }
 0x5e2   :  { %v3370_v8 = vunpack.i.h.bf16 %v3368_v6  ;;  %v3369_v9 = vunpack.i.l.bf16 %v3368_v6 }
 0x5e4   :  { %v460_v10 = vpack.c.bf16 %v3370_v8, %v3369_v9  ;;  %v2895_v8 = vld [vmem:[%s4692_s8] ss:$0 sm:$0xff] }
 0x5e6   :  { %3137 = vmatpush3.bf16.msra.mxu0 %v460_v10 }
 0x5e7   :  { %3148 = vmatprep.subr.bf16.mxu0 %v3874_v0 }
 0x5e8   :  { %v3493_v12 = vpop.eup %3492 }
 0x5e9   :  { %v764_v15 = vmul.f32 %v3493_v12, %v3481_v41 }
 0x5eb   :  { %v768_v16 = vpack.c.bf16 %v764_v15, %v763_v14 }
 0x5ed   :  { %3139 = vmatmul.mubr.msk.bf16.vlgmr.msra.gmra.mrb[20].mxu0 %vm254_vm1, %v768_v16 }
 0x5ee   :  { %3150 = vmatprep.mubr.msk.bf16.mxu0 %vm3875_vm0, %v3874_v0  ;;  %3149 = vmatpush3.bf16.msra.mxu0 %v3415_v17 }
 0x5ef   :  { %3160 = vmatprep.subr.bf16.mxu0 %v3874_v0 }
 0x614   :  { %v806_v18 = vpop.f32.mrb[8].mxu1 }
 0x615   :  { %v3122_v19 = vpop.f32.mrb[9].mxu1 }
 0x616   :  { %v809_v20 = vpop.f32.mrb[10].mxu1 }
 0x617   :  { %v945_v22 = vpack.c.bf16 %v809_v20, %v806_v18  ;;  %v3123_v25 = vpop.f32.mrb[11].mxu1 }
 0x619   :  { %3145 = vmatmul.mubr.msk.bf16.vlgmr.msra.gmra.mrb[16].mxu1 %vm254_vm1, %v945_v22 }
 0x61a   :  { %3155 = vmatpush3.bf16.msra.mxu1 %v3416_v21  ;;  %3156 = vmatprep.mubr.msk.bf16.mxu1 %vm3875_vm0, %v3874_v0 }
 0x61b   :  { %3166 = vmatprep.subr.bf16.mxu1 %v3874_v0 }
 0x689   :  { %v850_v26 = vpop.f32.mrb[16].mxu0 }
 0x68a   :  { %v3128_v29 = vpop.f32.mrb[17].mxu0 }
 0x68b   :  { %v853_v31 = vpop.f32.mrb[18].mxu0  ;;  %v894_v32 = vpop.f32.mrb[12].mxu1 }
 0x68c   :  { %v946_v34 = vpack.c.bf16 %v853_v31, %v850_v26  ;;  %v3129_v35 = vpop.f32.mrb[19].mxu0  ;;  %v3134_v36 = vpop.f32.mrb[13].mxu1 }
 0x68d   :  { %v897_v37 = vpop.f32.mrb[14].mxu1 }
 0x68e   :  { %v947_v38 = vpack.c.bf16 %v897_v37, %v894_v32  ;;  %v3135_v39 = vpop.f32.mrb[15].mxu1  ;;  %3151 = vmatmul.mubr.msk.bf16.vlgmr.msra.gmra.mrb[24].mxu0 %vm254_vm1, %v946_v34 }
 0x68f   :  { %3161 = vmatpush3.bf16.msra.mxu0 %v3417_v33  ;;  %3162 = vmatprep.mubr.msk.bf16.mxu0 %vm3875_vm0, %v3874_v0 }
 0x690   :  { %3157 = vmatmul.mubr.msk.bf16.vlgmr.msra.gmra.mrb[20].mxu1 %vm254_vm1, %v947_v38  ;;  %3178 = vmatprep.subr.bf16.mxu0 %v3874_v0 }
 0x691   :  { %3174 = vmatprep.mubr.msk.bf16.mxu1 %vm3875_vm0, %v3874_v0 }
 0x6c0   :  { %v938_v40 = vpop.f32.mrb[20].mxu0 }
 0x6c1   :  { %v3140_v41 = vpop.f32.mrb[21].mxu0 }
 0x6c2   :  { %v941_v42 = vpop.f32.mrb[22].mxu0 }
 0x6c3   :  { %v948_v43 = vpack.c.bf16 %v941_v42, %v938_v40  ;;  %v3141_v45 = vpop.f32.mrb[23].mxu0  ;;  %v2896_v42 = vld [vmem:[#allocation8] ss:$0 sm:$0xff] }
 0x6c4   :  { %v2897_v45 = vld [vmem:[#allocation10] ss:$0 sm:$0xff] }
 0x6c5   :  { %3163 = vmatmul.mubr.msk.bf16.vlgmr.msra.gmra.mrb[28].mxu0 %vm254_vm1, %v948_v43 }
 0x6c6   :  { %3194 = vmatprep.mubr.msk.bf16.mxu0 %vm3875_vm0, %v3874_v0 }
 0x6ec   :  { %v1000_v46 = vpop.f32.mrb[16].mxu1 }
 0x6ed   :  { %v3146_v47 = vpop.f32.mrb[17].mxu1  ;;  %v1157_v51 = vsel %vm366_vm2, %v1000_v46, 0.0 }
 0x6ee   :  { %v1003_v48 = vpop.f32.mrb[18].mxu1 }
 0x6ef   :  { %v3147_v49 = vpop.f32.mrb[19].mxu1  ;;  %v1164_v57 = vsel %vm366_vm2, %v1003_v48, 0.0  ;;  %v2898_v48 = vld [vmem:[#allocation7] ss:$0 sm:$0xff] }
 0x761   :  { %v1050_v50 = vpop.f32.mrb[24].mxu0 }
 0x762   :  { %v1158_v52 = vsel %vm366_vm2, %v1050_v50, 0.0  ;;  %v3152_v53 = vpop.f32.mrb[25].mxu0 }
 0x763   :  { %v1159_v54 = vadd.f32 %v1158_v52, %v1157_v51  ;;  %v1053_v55 = vpop.f32.mrb[26].mxu0  ;;  %v1100_v56 = vpop.f32.mrb[20].mxu1 }
 0x764   :  { %v1165_v58 = vsel %vm366_vm2, %v1053_v55, 0.0  ;;  %v1160_v44 = vsel %vm366_vm2, %v1100_v56, 0.0  ;;  %v3153_v59 = vpop.f32.mrb[27].mxu0  ;;  %v3158_v60 = vpop.f32.mrb[21].mxu1 }
 0x765   :  { %v1166_v61 = vadd.f32 %v1165_v58, %v1164_v57  ;;  %v1161_v62 = vadd.f32 %v1160_v44, %v1159_v54  ;;  %v1103_v63 = vpop.f32.mrb[22].mxu1 }
 0x766   :  { %v1167_v1 = vsel %vm366_vm2, %v1103_v63, 0.0  ;;  %v3159_v2 = vpop.f32.mrb[23].mxu1 }
 0x767   :  { %v1168_v4 = vadd.f32 %v1167_v1, %v1166_v61 }
 0x798   :  { %v1150_v5 = vpop.f32.mrb[28].mxu0 }
 0x799   :  { %v1162_v6 = vsel %vm366_vm2, %v1150_v5, 0.0  ;;  %v3164_v9 = vpop.f32.mrb[29].mxu0  ;;  %v3419_v5 = vld [vmem:[#allocation17 + $0x8] sm:$0xff]  }
 0x79a   :  { %v1163_v10 = vadd.f32 %v1162_v6, %v1161_v62  ;;  %v1153_v11 = vpop.f32.mrb[30].mxu0  ;;  %v3420_v6 = vld [vmem:[#allocation17 + $0x10] sm:$0xff]   ;;  %v3422_v9 = vld [vmem:[%s4702_s18] sm:$0xff]  }
 0x79b   :  { %v1169_v12 = vsel %vm366_vm2, %v1153_v11, 0.0  ;;  %v3165_v14 = vpop.f32.mrb[31].mxu0  ;;  %3179 = vmatpush3.bf16.msra.mxu0 %v3422_v9  ;;  %v3424_v11 = vld [vmem:[%s4702_s18 + $0x10] sm:$0xff]  }
 0x79c   :  { %v1178_v15 = vadd.f32 %v2895_v8, %v1163_v10  ;;  %v1170_v16 = vadd.f32 %v1169_v12, %v1168_v4  ;;  %v3418_v4 = vld [vmem:[#allocation17] sm:$0xff]   ;;  %3180 = vmatprep.subr.bf16.mxu0 %v3874_v0  ;;  %v3425_v12 = vld [vmem:[%s4702_s18 + $0x18] sm:$0xff]  }
 0x79d   :  { %3167 = vmatpush3.bf16.msra.mxu1 %v3418_v4  ;;  %v3423_v10 = vld [vmem:[%s4702_s18 + $0x8] sm:$0xff]   ;;  %v3426_v14 = vld [vmem:[%s4702_s18 + $0x20] sm:$0xff]   ;;  %v3435_v9 = vld [vmem:[%s4726_s9 + $0x54] ss:$8 sps:$4 sm:$0xff]  }
 0x79e   :  { %v1179_v17 = vadd.f32 %v2895_v8, %v1170_v16  ;;  %v1180_v18 = vadd.f32 %v1178_v15, %v4238_v23  ;;  %3168 = vmatprep.subr.bf16.mxu1 %v3874_v0  ;;  %v3421_v8 = vld [vmem:[#allocation17 + $0x18] sm:$0xff]   ;;  %v3427_v15 = vld [vmem:[%s4702_s18 + $0x28] sm:$0xff]  }
 0x79f   :  { %3181 = vmatpush3.bf16.msra.mxu0 %v3423_v10  ;;  %v3433_v10 = vld [vmem:[%s4726_s9 + $0x50] ss:$8 sps:$4 sm:$0xff]  }
 0x7a0   :  { %v1182_v19 = vsel %vm366_vm2, %v1180_v18, 0.0  ;;  %v1181_v20 = vadd.f32 %v1179_v17, %v4240_v24  ;;  %3182 = vmatprep.subr.bf16.mxu0 %v3874_v0 }
 0x7a1   :  { %1183 = vadd.xlane.f32.xlu0 %v1182_v19  ;;  %3169 = vmatpush3.bf16.msra.mxu1 %v3419_v5 }
 0x7a2   :  { %v1185_v21 = vsel %vm366_vm2, %v1181_v20, 0.0  ;;  %3170 = vmatprep.subr.bf16.mxu1 %v3874_v0 }
 0x7a3   :  { %1186 = vadd.xlane.f32.xlu1 %v1185_v21  ;;  %3183 = vmatpush3.bf16.msra.mxu0 %v3424_v11  ;;  %v3438_v11 = vld [vmem:[%s4726_s9 + $0x64] ss:$8 sps:$4 sm:$0xff]  }
 0x7a4   :  { %3184 = vmatprep.subr.bf16.mxu0 %v3874_v0 }
 0x7a5   :  { %3171 = vmatpush3.bf16.msra.mxu1 %v3420_v6  ;;  %v3432_v6 = vld [vmem:[%s4726_s9 + $0x44] ss:$8 sps:$4 sm:$0xff]  }
 0x7a6   :  { %3172 = vmatprep.subr.bf16.mxu1 %v3874_v0 }
 0x7a7   :  { %3185 = vmatpush3.bf16.msra.mxu0 %v3425_v12  ;;  %v3436_v12 = vld [vmem:[%s4726_s9 + $0x60] ss:$8 sps:$4 sm:$0xff]  }
 0x7a8   :  { %3186 = vmatprep.subr.bf16.mxu0 %v3874_v0 }
 0x7a9   :  { %3173 = vmatpush3.bf16.msra.mxu1 %v3421_v8  ;;  %v3430_v8 = vld [vmem:[%s4726_s9 + $0x40] ss:$8 sps:$4 sm:$0xff]  }
 0x7aa   :  { %1591 = vmatprep.subr.bf16.mxu1 %v3432_v6 }
 0x7ab   :  { %3187 = vmatpush3.bf16.msra.mxu0 %v3426_v14  ;;  %v3439_v14 = vld [vmem:[%s4726_s9 + $0x70] ss:$8 sps:$4 sm:$0xff]  }
 0x7ac   :  { %3188 = vmatprep.subr.bf16.mxu0 %v3874_v0 }
 0x7af   :  { %3189 = vmatpush3.bf16.msra.mxu0 %v3427_v15  ;;  %v3441_v15 = vld [vmem:[%s4726_s9 + $0x74] ss:$8 sps:$4 sm:$0xff]  }
 0x7b0   :  { %3190 = vmatprep.subr.bf16.mxu0 %v3874_v0 }
 0x82e   :  { %v1184_v22 = vpop.xlane.xlu0 %1183 }
 0x82f   :  { %v1189_v25 = vmul.f32 0.015625, %v1184_v22 }
 0x830   :  { %v1187_v26 = vpop.xlane.xlu1 %1186 }
 0x831   :  { %v1191_v29 = vsub.f32 %v1180_v18, %v1189_v25  ;;  %v1190_v31 = vmul.f32 0.015625, %v1187_v26  ;;  %v2899_v26 = vld [vmem:[#allocation11] ss:$0 sm:$0xff] }
 0x833   :  { %v1192_v32 = vsub.f32 %v1181_v20, %v1190_v31  ;;  %v1193_v33 = vmul.f32 %v1191_v29, %v1191_v29 }
 0x835   :  { %v1195_v34 = vsel %vm366_vm2, %v1193_v33, 0.0  ;;  %v1194_v35 = vmul.f32 %v1192_v32, %v1192_v32  ;;  %v2900_v33 = vld [vmem:[#allocation13] ss:$0 sm:$0xff] }
 0x836   :  { %1196 = vadd.xlane.f32.xlu0 %v1195_v34 }
 0x837   :  { %v1198_v23 = vsel %vm366_vm2, %v1194_v35, 0.0 }
 0x83a   :  { %1199 = vadd.xlane.f32.xlu0 %v1198_v23 }
 0x8c3   :  { %v1197_v36 = vpop.xlane.xlu0 %1196 }
 0x8c4   :  { %v1201_v24 = vmul.f32 0.015625, %v1197_v36 }
 0x8c6   :  { %v1203_v37 = vadd.f32 1e-05, %v1201_v24  ;;  %v3428_v24 = vld [vmem:[%s4702_s18 + $0x30] sm:$0xff]  }
 0x8c7   :  { %v1200_v38 = vpop.xlane.xlu0 %1199  ;;  %3191 = vmatpush3.bf16.msra.mxu0 %v3428_v24  ;;  %v1536_v24 = vld [vmem:[#allocation5 + $0x2] sm:$0x3] }
 0x8c8   :  { %3494 = vrsqrt.f32 %v1203_v37  ;;  %v1202_v39 = vmul.f32 0.015625, %v1200_v38  ;;  %3192 = vmatprep.subr.bf16.mxu0 %v3874_v0  ;;  %v3429_v37 = vld [vmem:[%s4702_s18 + $0x38] sm:$0xff]   ;;  %v2901_v38 = vld [vmem:[#allocation19] ss:$0 sm:$0xff] }
 0x8ca   :  { %v1204_v40 = vadd.f32 1e-05, %v1202_v39 }
 0x8cb   :  { %3193 = vmatpush3.bf16.msra.mxu0 %v3429_v37  ;;  %v1541_v37 = vrot.slane %v1536_v24, %v318_v28 }
 0x8cc   :  { %3496 = vrsqrt.f32 %v1204_v40  ;;  %3204 = vmatprep.subr.bf16.mxu0 %v3874_v0 }
 0x8d2   :  { %v3495_v41 = vpop.eup %3494 }
 0x8d3   :  { %v1207_v43 = vmul.f32 %v3495_v41, %v1191_v29 }
 0x8d5   :  { %v1216_v46 = vmul.f32 %v2896_v42, %v1207_v43 }
 0x8d6   :  { %v3497_v47 = vpop.eup %3496 }
 0x8d7   :  { %v1225_v49 = vadd.f32 %v2897_v45, %v1216_v46  ;;  %v1208_v50 = vmul.f32 %v3497_v47, %v1192_v32 }
 0x8d9   :  { %v1234_v51 = vadd.f32 %v2898_v48, %v1225_v49  ;;  %v1217_v52 = vmul.f32 %v2896_v42, %v1208_v50 }
 0x8db   :  { %v1236_v53 = vsel %vm366_vm2, %v1234_v51, 0.0  ;;  %v1226_v54 = vadd.f32 %v2897_v45, %v1217_v52 }
 0x8dc   :  { %1237 = vadd.xlane.f32.xlu1 %v1236_v53 }
 0x8dd   :  { %v1235_v55 = vadd.f32 %v2898_v48, %v1226_v54  ;;  %v2907_v48 = vld [vmem:[#allocation20] ss:$0 sm:$0xff] }
 0x8df   :  { %v1239_v56 = vsel %vm366_vm2, %v1235_v55, 0.0 }
 0x8e0   :  { %1240 = vadd.xlane.f32.xlu0 %v1239_v56 }
 0x969   :  { %v1238_v57 = vpop.xlane.xlu1 %1237 }
 0x96a   :  { %v1242_v58 = vmul.f32 0.015625, %v1238_v57 }
 0x96c   :  { %v1244_v44 = vsub.f32 %v1234_v51, %v1242_v58 }
 0x96d   :  { %v1241_v59 = vpop.xlane.xlu0 %1240 }
 0x96e   :  { %v1243_v60 = vmul.f32 0.015625, %v1241_v59  ;;  %v1246_v61 = vmul.f32 %v1244_v44, %v1244_v44 }
 0x970   :  { %v1245_v62 = vsub.f32 %v1235_v55, %v1243_v60  ;;  %v1248_v63 = vsel %vm366_vm2, %v1246_v61, 0.0 }
 0x971   :  { %1249 = vadd.xlane.f32.xlu1 %v1248_v63 }
 0x972   :  { %v1247_v1 = vmul.f32 %v1245_v62, %v1245_v62 }
 0x974   :  { %v1251_v2 = vsel %vm366_vm2, %v1247_v1, 0.0 }
 0x975   :  { %1252 = vadd.xlane.f32.xlu0 %v1251_v2 }
 0x9fe   :  { %v1250_v16 = vpop.xlane.xlu1 %1249 }
 0x9ff   :  { %v1254_v17 = vmul.f32 0.015625, %v1250_v16 }
 0xa01   :  { %v1256_v18 = vadd.f32 1e-05, %v1254_v17 }
 0xa02   :  { %v1253_v19 = vpop.xlane.xlu0 %1252 }
 0xa03   :  { %3498 = vrsqrt.f32 %v1256_v18  ;;  %v1255_v20 = vmul.f32 0.015625, %v1253_v19 }
 0xa05   :  { %v1257_v21 = vadd.f32 1e-05, %v1255_v20 }
 0xa07   :  { %3500 = vrsqrt.f32 %v1257_v21 }
 0xa0d   :  { %v3499_v22 = vpop.eup %3498 }
 0xa0e   :  { %v1260_v25 = vmul.f32 %v3499_v22, %v1244_v44 }
 0xa10   :  { %v1269_v31 = vmul.f32 %v2899_v26, %v1260_v25  ;;  %v2916_v25 = vld [vmem:[#allocation14] ss:$0 sm:$0xff] }
 0xa11   :  { %v3501_v29 = vpop.eup %3500 }
 0xa12   :  { %v1261_v32 = vmul.f32 %v3501_v29, %v1245_v62  ;;  %v1278_v35 = vadd.f32 %v2900_v33, %v1269_v31 }
 0xa14   :  { %v1270_v34 = vmul.f32 %v2899_v26, %v1261_v32 }
 0xa16   :  { %v1279_v23 = vadd.f32 %v2900_v33, %v1270_v34  ;;  %v2917_v33 = vld [vmem:[#allocation16] ss:$0 sm:$0xff] }
 0xa18   :  { %v1280_v36 = vpack.c.bf16 %v1279_v23, %v1278_v35 }
 0xa1a   :  { %3175 = vmatmul.mubr.msk.bf16.vlgmr.msra.gmra.mrb[24].mxu1 %vm366_vm2, %v1280_v36 }
 0xa1b   :  { %1623 = vmatprep.mubr.bf16.mxu1 %v3876_v13  ;;  %1592 = vmatpush1.bf16.msra.mxu1 %v3430_v8 }
 0xa1c   :  { %1593 = vmatprep.subr.bf16.mxu1 %v3435_v9 }
 0xa1f   :  { %1594 = vmatpush1.bf16.msra.mxu1 %v3433_v10 }
 0xa20   :  { %1595 = vmatprep.subr.bf16.mxu1 %v3438_v11 }
 0xa23   :  { %1596 = vmatpush1.bf16.msra.mxu1 %v3436_v12 }
 0xa24   :  { %1597 = vmatprep.subr.bf16.mxu1 %v3441_v15 }
 0xa27   :  { %1598 = vmatpush1.bf16.msra.mxu1 %v3439_v14 }
 0xa28   :  { %3198 = vmatprep.subr.bf16.mxu1 %v3874_v0 }
 0xaed   :  { %v1357_v39 = vpop.f32.mrb[24].mxu1 }
 0xaee   :  { %v1358_v40 = vadd.f32 %v2901_v38, %v1357_v39  ;;  %v3176_v41 = vpop.f32.mrb[25].mxu1  ;;  %v1545_v39 = vrot.slane %v1536_v24, %v322_v30 }
 0xaef   :  { %v1360_v42 = vpop.f32.mrb[26].mxu1 }
 0xaf0   :  { %v1361_v13 = vadd.f32 %v2901_v38, %v1360_v42  ;;  %v3177_v43 = vpop.f32.mrb[27].mxu1  ;;  %v1364_v45 = vmax.f32 %v1358_v40, 0.0 }
 0xaf2   :  { %v1365_v46 = vmax.f32 %v1361_v13, 0.0 }
 0xaf4   :  { %v1366_v47 = vpack.c.bf16 %v1365_v46, %v1364_v45 }
 0xaf6   :  { %3195 = vmatmul.mubr.bf16.vlgmr.msra.gmra.mrb[32].mxu0 %v1366_v47 }
 0xaf7   :  { %3206 = vmatprep.mubr.msk.bf16.mxu0 %vm3875_vm0, %v3874_v0 }
 0xbc9   :  { %v1472_v49 = vpop.f32.mrb[32].mxu0 }
 0xbca   :  { %v1473_v50 = vadd.f32 %v2907_v48, %v1472_v49  ;;  %v3196_v51 = vpop.f32.mrb[33].mxu0 }
 0xbcb   :  { %v1475_v52 = vpop.f32.mrb[34].mxu0 }
 0xbcc   :  { %v1476_v53 = vadd.f32 %v2907_v48, %v1475_v52  ;;  %v3197_v54 = vpop.f32.mrb[35].mxu0  ;;  %v1479_v55 = vadd.f32 %v1473_v50, %v1278_v35 }
 0xbce   :  { %v1481_v56 = vsel %vm366_vm2, %v1479_v55, 0.0  ;;  %v1480_v57 = vadd.f32 %v1476_v53, %v1279_v23 }
 0xbcf   :  { %1482 = vadd.xlane.f32.xlu1 %v1481_v56 }
 0xbd0   :  { %v1484_v58 = vsel %vm366_vm2, %v1480_v57, 0.0 }
 0xbd1   :  { %1485 = vadd.xlane.f32.xlu0 %v1484_v58 }
 0xc5c   :  { %v1483_v44 = vpop.xlane.xlu1 %1482 }
 0xc5d   :  { %v1487_v59 = vmul.f32 0.015625, %v1483_v44 }
 0xc5e   :  { %v1486_v60 = vpop.xlane.xlu0 %1485 }
 0xc5f   :  { %v1489_v61 = vsub.f32 %v1479_v55, %v1487_v59  ;;  %v1488_v62 = vmul.f32 0.015625, %v1486_v60 }
 0xc61   :  { %v1490_v63 = vsub.f32 %v1480_v57, %v1488_v62  ;;  %v1491_v1 = vmul.f32 %v1489_v61, %v1489_v61 }
 0xc63   :  { %v1493_v2 = vsel %vm366_vm2, %v1491_v1, 0.0  ;;  %v1492_v4 = vmul.f32 %v1490_v63, %v1490_v63 }
 0xc64   :  { %1494 = vadd.xlane.f32.xlu1 %v1493_v2 }
 0xc65   :  { %v1496_v5 = vsel %vm366_vm2, %v1492_v4, 0.0 }
 0xc66   :  { %1497 = vadd.xlane.f32.xlu0 %v1496_v5 }
 0xcf1   :  { %v1495_v16 = vpop.xlane.xlu1 %1494 }
 0xcf2   :  { %v1499_v17 = vmul.f32 0.015625, %v1495_v16 }
 0xcf3   :  { %v1498_v18 = vpop.xlane.xlu0 %1497 }
 0xcf4   :  { %v1501_v19 = vadd.f32 1e-05, %v1499_v17  ;;  %v1500_v20 = vmul.f32 0.015625, %v1498_v18 }
 0xcf6   :  { %3502 = vrsqrt.f32 %v1501_v19  ;;  %v1502_v21 = vadd.f32 1e-05, %v1500_v20 }
 0xcf8   :  { %3504 = vrsqrt.f32 %v1502_v21 }
 0xd00   :  { %v3503_v22 = vpop.eup %3502 }
 0xd01   :  { %v1505_v26 = vmul.f32 %v3503_v22, %v1489_v61 }
 0xd02   :  { %v3505_v29 = vpop.eup %3504 }
 0xd03   :  { %v1514_v31 = vmul.f32 %v2916_v25, %v1505_v26  ;;  %v1506_v32 = vmul.f32 %v3505_v29, %v1490_v63 }
 0xd05   :  { %v1515_v34 = vmul.f32 %v2916_v25, %v1506_v32  ;;  %v4465_v35 = vadd.f32 %v2917_v33, %v1514_v31 }
 0xd07   :  { %v4467_v23 = vadd.f32 %v2917_v33, %v1515_v34 }
 0xd09   :  { %v1525_v36 = vpack.c.bf16 %v4467_v23, %v4465_v35 }
 0xd0b   :  { %2934 = vmatmul.mubr.msk.bf16.vlgmr.msra.gmra.mrb[28].mxu1 %vm366_vm2, %v1525_v36  ;;  %v3551_v36 = vld [vmem:[%s4728_s10 + $0x8] sm:$0xff] }
 0xd0c   :  { %3200 = vmatprep.mubr.msk.bf16.mxu1 %vm3875_vm0, %v3874_v0 }
 0xdde   :  { %v1625_v38 = vpop.f32.mrb[28].mxu1 }
 0xddf   :  { %v1627_v40 = vpop.f32.mrb[29].mxu1  ;;  %v1626_v42 = vadd.f32 %v1625_v38, %v1541_v37 }
 0xde0   :  { %v1629_v41 = vpop.f32.mrb[30].mxu1  ;;  %v1628_v45 = vadd.f32 %v1627_v40, %v1545_v39 }
 0xde1   :  { %v1630_v13 = vadd.f32 %v1629_v41, %v1541_v37  ;;  %v1631_v43 = vpop.f32.mrb[31].mxu1 }
 0xde2   :  { %v1632_v46 = vadd.f32 %v1631_v43, %v1545_v39 }
 0xde3   :  { %v3376_v47 = vpack.i.bf16 %v1630_v13, %v1626_v42  ;;  %v1654_v48 = vpack.c.bf16 %v1630_v13, %v1626_v42 }
 0xde4   :  { %v1678_v49 = vpack.c.bf16 %v1632_v46, %v1628_v45  ;;  %v4478_v50 = vpack.i.bf16 %v1632_v46, %v1628_v45 }
 0xde5   :  { %3377 = vrot.lane.b32.xlu0 %v3376_v47, %s3879_s30  ;;  %3372 = vrot.lane.b32.xlu1 %v3376_v47, %s3878_s11 }
 0xde9   :  { %3382 = vrot.lane.b32.xlu1 %v3376_v47, %s3877_s12 }
 0xded   :  { %1683 = vrot.lane.b32.xlu1 %v1654_v48, %s3863_s14 }
 0xe57   :  { %v3378_v27 = vpop.permute.xlu0 %3377  ;;  %v3373_v28 = vpop.permute.xlu1 %3372 }
 0xe58   :  { %v3380_v30 = vunpack.i.h.bf16 %v3378_v27  ;;  %v3379_v51 = vunpack.i.l.bf16 %v3378_v27  ;;  %v3375_v52 = vunpack.i.h.bf16 %v3373_v28  ;;  %v3374_v53 = vunpack.i.l.bf16 %v3373_v28 }
 0xe5a   :  { %v1655_v54 = vpack.c.bf16 %v3375_v52, %v3374_v53  ;;  %v1656_v55 = vpack.c.bf16 %v3380_v30, %v3379_v51 }
 0xe5b   :  { %v3383_v56 = vpop.permute.xlu1 %3382 }
 0xe5c   :  { %v3385_v57 = vunpack.i.h.bf16 %v3383_v56  ;;  %v3384_v58 = vunpack.i.l.bf16 %v3383_v56  ;;  %1733 = vrot.lane.b32.xlu0 %v1655_v54, %s3863_s14  ;;  %1783 = vrot.lane.b32.xlu1 %v1656_v55, %s3863_s14 }
 0xe5e   :  { %v1657_v44 = vpack.c.bf16 %v3385_v57, %v3384_v58 }
 0xe5f   :  { %v1684_v59 = vpop.permute.xlu1 %1683 }
 0xe60   :  { %v1689_v60 = vsel %vm254_vm1, %v1684_v59, 0  ;;  %1833 = vrot.lane.b32.xlu0 %v1657_v44, %s3863_s14 }
 0xe61   :  { %3199 = vmatpush3.bf16.xpose.msra.mxu1 %v1689_v60 }
 0xe62   :  { %3210 = vmatprep.subr.bf16.mxu1 %v3874_v0 }
 0xe68   :  { %3201 = vmatmul.mubr.msk.bf16.vlgmr.msra.gmra.mrb[32].mxu1 %vm254_vm1, %v1654_v48 }
 0xe69   :  { %3212 = vmatprep.mubr.msk.bf16.mxu1 %vm3875_vm0, %v3874_v0 }
 0xece   :  { %v1734_v61 = vpop.permute.xlu0 %1733  ;;  %v1784_v62 = vpop.permute.xlu1 %1783 }
 0xecf   :  { %v1739_v63 = vsel %vm254_vm1, %v1734_v61, 0  ;;  %v1789_v1 = vsel %vm254_vm1, %v1784_v62, 0 }
 0xed0   :  { %3205 = vmatpush3.bf16.xpose.msra.mxu0 %v1739_v63  ;;  %3211 = vmatpush3.bf16.xpose.msra.mxu1 %v1789_v1 }
 0xed1   :  { %3216 = vmatprep.subr.bf16.mxu0 %v3874_v0  ;;  %3222 = vmatprep.subr.bf16.mxu1 %v3874_v0 }
 0xed2   :  { %v1834_v2 = vpop.permute.xlu0 %1833 }
 0xed3   :  { %v1839_v4 = vsel %vm254_vm1, %v1834_v2, 0 }
 0xed7   :  { %3207 = vmatmul.mubr.msk.bf16.vlgmr.msra.gmra.mrb[36].mxu0 %vm254_vm1, %v1655_v54  ;;  %3213 = vmatmul.mubr.msk.bf16.vlgmr.msra.gmra.mrb[36].mxu1 %vm254_vm1, %v1656_v55 }
 0xed8   :  { %3217 = vmatpush3.bf16.xpose.msra.mxu0 %v1839_v4  ;;  %3223 = vmatpush3.bf16.msra.mxu1 %v1678_v49 }
 0xed9   :  { %3218 = vmatprep.mubr.msk.bf16.mxu0 %vm3875_vm0, %v3874_v0  ;;  %3224 = vmatprep.mubr.msk.bf16.mxu1 %vm3875_vm0, %v3874_v0 }
 0xeda   :  { %3234 = vmatprep.subr.bf16.mxu1 %v3874_v0  ;;  %3228 = vmatprep.subr.bf16.mxu0 %v3874_v0 }
 0xedf   :  { %3219 = vmatmul.mubr.msk.bf16.vlgmr.msra.gmra.mrb[40].mxu0 %vm254_vm1, %v1657_v44 }
 0xee0   :  { %3230 = vmatprep.mubr.msk.bf16.mxu0 %vm3875_vm0, %v3874_v0 }
 0xf3b   :  { %v1725_v5 = vpop.f32.mrb[32].mxu1 }
 0xf3c   :  { %v1882_v6 = vmul.f32 0.25, %v1725_v5  ;;  %v3202_v8 = vpop.f32.mrb[33].mxu1 }
 0xf3d   :  { %v1728_v9 = vpop.f32.mrb[34].mxu1 }
 0xf3e   :  { %v1883_v10 = vmul.f32 0.25, %v1728_v9  ;;  %v3203_v11 = vpop.f32.mrb[35].mxu1  ;;  %v1890_v12 = vadd.f32 %v1882_v6, %v4288_v3 }
 0xf40   :  { %v1898_v14 = vsel %vm254_vm1, %v1890_v12, -inf  ;;  %v1891_v15 = vadd.f32 %v1883_v10, %v4293_v7  ;;  %v3550_v7 = vld [vmem:[%s4728_s10] sm:$0xff] }
 0xf41   :  { %1899 = vmax.xlane.f32.xlu1 %v1898_v14 }
 0xf42   :  { %v1901_v16 = vsel %vm254_vm1, %v1891_v15, -inf }
 0xf43   :  { %1902 = vmax.xlane.f32.xlu0 %v1901_v16 }
 0xfaa   :  { %v1775_v17 = vpop.f32.mrb[36].mxu0  ;;  %v1825_v18 = vpop.f32.mrb[36].mxu1 }
 0xfab   :  { %v1884_v19 = vmul.f32 0.25, %v1775_v17  ;;  %v1886_v20 = vmul.f32 0.25, %v1825_v18  ;;  %v3208_v21 = vpop.f32.mrb[37].mxu0  ;;  %v3214_v22 = vpop.f32.mrb[37].mxu1 }
 0xfac   :  { %v1778_v25 = vpop.f32.mrb[38].mxu0  ;;  %v1828_v26 = vpop.f32.mrb[38].mxu1 }
 0xfad   :  { %v1885_v29 = vmul.f32 0.25, %v1778_v25  ;;  %v1887_v31 = vmul.f32 0.25, %v1828_v26  ;;  %v3209_v32 = vpop.f32.mrb[39].mxu0  ;;  %v3215_v3 = vpop.f32.mrb[39].mxu1  ;;  %v1892_v33 = vadd.f32 %v3550_v7, %v1884_v19  ;;  %v1894_v37 = vadd.f32 %v3550_v7, %v1886_v20 }
 0xfaf   :  { %v1904_v34 = vsel %vm254_vm1, %v1892_v33, -inf  ;;  %v1893_v24 = vadd.f32 %v3551_v36, %v1885_v29  ;;  %v1895_v39 = vadd.f32 %v3551_v36, %v1887_v31  ;;  %v1910_v13 = vsel %vm254_vm1, %v1894_v37, -inf }
 0xfb0   :  { %1905 = vmax.xlane.f32.xlu0 %v1904_v34 }
 0xfb1   :  { %v1907_v38 = vsel %vm254_vm1, %v1893_v24, -inf  ;;  %v1913_v47 = vsel %vm254_vm1, %v1895_v39, -inf }
 0xfb2   :  { %1908 = vmax.xlane.f32.xlu1 %v1907_v38  ;;  %v1875_v40 = vpop.f32.mrb[40].mxu0 }
 0xfb3   :  { %v1888_v41 = vmul.f32 0.25, %v1875_v40  ;;  %v3220_v42 = vpop.f32.mrb[41].mxu0 }
 0xfb4   :  { %1911 = vmax.xlane.f32.xlu0 %v1910_v13  ;;  %v1878_v43 = vpop.f32.mrb[42].mxu0 }
 0xfb5   :  { %v1889_v45 = vmul.f32 0.25, %v1878_v43  ;;  %v3221_v46 = vpop.f32.mrb[43].mxu0  ;;  %v1896_v48 = vadd.f32 %v3550_v7, %v1888_v41 }
 0xfb6   :  { %1914 = vmax.xlane.f32.xlu1 %v1913_v47 }
 0xfb7   :  { %v1916_v49 = vsel %vm254_vm1, %v1896_v48, -inf  ;;  %v1897_v27 = vadd.f32 %v3551_v36, %v1889_v45 }
 0xfb8   :  { %1917 = vmax.xlane.f32.xlu0 %v1916_v49 }
 0xfb9   :  { %v1919_v28 = vsel %vm254_vm1, %v1897_v27, -inf }
 0xfba   :  { %1920 = vmax.xlane.f32.xlu1 %v1919_v28 }
 0xfce   :  { %v1900_v30 = vpop.xlane.xlu1 %1899 }
 0xfcf   :  { %v1922_v51 = vsub.f32 %v1890_v12, %v1900_v30 }
 0xfd0   :  { %v1903_v52 = vpop.xlane.xlu0 %1902 }
 0xfd1   :  { %v1930_v53 = vmul.f32 1.442695, %v1922_v51  ;;  %v1923_v54 = vsub.f32 %v1891_v15, %v1903_v52 }
 0xfd3   :  { %3506 = vpow2.f32 %v1930_v53  ;;  %v1932_v55 = vmul.f32 1.442695, %v1923_v54 }
 0xfd5   :  { %3508 = vpow2.f32 %v1932_v55 }
 0xfdd   :  { %v3507_v56 = vpop.eup %3506 }
 0xfde   :  { %v1946_v57 = vsel %vm254_vm1, %v3507_v56, 0.0 }
 0xfdf   :  { %v3509_v58 = vpop.eup %3508  ;;  %1947 = vadd.xlane.f32.xlu0 %v1946_v57 }
 0xfe0   :  { %v1949_v44 = vsel %vm254_vm1, %v3509_v58, 0.0 }
 0xfe1   :  { %1950 = vadd.xlane.f32.xlu1 %v1949_v44 }
0x103d   :  { %v1906_v59 = vpop.xlane.xlu0 %1905 }
0x103e   :  { %v1924_v60 = vsub.f32 %v1892_v33, %v1906_v59 }
0x103f   :  { %v1909_v61 = vpop.xlane.xlu1 %1908 }
0x1040   :  { %v1934_v62 = vmul.f32 1.442695, %v1924_v60  ;;  %v1925_v63 = vsub.f32 %v1893_v24, %v1909_v61 }
0x1041   :  { %v1912_v1 = vpop.xlane.xlu0 %1911 }
0x1042   :  { %3510 = vpow2.f32 %v1934_v62  ;;  %v1936_v2 = vmul.f32 1.442695, %v1925_v63  ;;  %v1926_v4 = vsub.f32 %v1894_v37, %v1912_v1 }
0x1043   :  { %v1915_v5 = vpop.xlane.xlu1 %1914 }
0x1044   :  { %3512 = vpow2.f32 %v1936_v2  ;;  %v1938_v6 = vmul.f32 1.442695, %v1926_v4  ;;  %v1927_v8 = vsub.f32 %v1895_v39, %v1915_v5 }
0x1045   :  { %v1918_v9 = vpop.xlane.xlu0 %1917 }
0x1046   :  { %3514 = vpow2.f32 %v1938_v6  ;;  %v1940_v10 = vmul.f32 1.442695, %v1927_v8  ;;  %v1928_v11 = vsub.f32 %v1896_v48, %v1918_v9  ;;  %v3443_v8 = vld [vmem:[%s4691_s7 + $0x28] sm:$0xff]  }
0x1047   :  { %v1921_v26 = vpop.xlane.xlu1 %1920 }
0x1048   :  { %3516 = vpow2.f32 %v1940_v10  ;;  %v1942_v12 = vmul.f32 1.442695, %v1928_v11  ;;  %v1929_v32 = vsub.f32 %v1897_v27, %v1921_v26 }
0x104a   :  { %3518 = vpow2.f32 %v1942_v12  ;;  %v1944_v7 = vmul.f32 1.442695, %v1929_v32  ;;  %v3444_v12 = vld [vmem:[%s4691_s7 + $0x30] sm:$0xff]  }
0x104c   :  { %v3511_v14 = vpop.eup %3510 }
0x104d   :  { %v1952_v15 = vsel %vm254_vm1, %v3511_v14, 0.0 }
0x104e   :  { %v3513_v16 = vpop.eup %3512  ;;  %1953 = vadd.xlane.f32.xlu0 %v1952_v15 }
0x104f   :  { %v1955_v17 = vsel %vm254_vm1, %v3513_v16, 0.0 }
0x1050   :  { %v3515_v18 = vpop.eup %3514  ;;  %1956 = vadd.xlane.f32.xlu1 %v1955_v17 }
0x1051   :  { %v1958_v19 = vsel %vm254_vm1, %v3515_v18, 0.0 }
0x1052   :  { %v3517_v20 = vpop.eup %3516  ;;  %1959 = vadd.xlane.f32.xlu0 %v1958_v19 }
0x1053   :  { %v1961_v21 = vsel %vm254_vm1, %v3517_v20, 0.0 }
0x1054   :  { %v4530_v22 = vpop.eup %3518  ;;  %1962 = vadd.xlane.f32.xlu1 %v1961_v21 }
0x1055   :  { %v1964_v25 = vsel %vm254_vm1, %v4530_v22, 0.0 }
0x1056   :  { %1965 = vadd.xlane.f32.xlu0 %v1964_v25 }
0x1065   :  { %3392 = vrot.lane.b32.xlu1 %v4478_v50, %s3879_s30 }
0x106c   :  { %3387 = vrot.lane.b32.xlu0 %v4478_v50, %s3878_s11  ;;  %v1948_v29 = vpop.xlane.xlu0 %1947 }
0x106d   :  { %3520 = vrcp.f32 %v1948_v29 }
0x106e   :  { %v1951_v31 = vpop.xlane.xlu1 %1950 }
0x106f   :  { %3522 = vrcp.f32 %v1951_v31 }
0x1070   :  { %3524 = vpow2.f32 %v1944_v7 }
0x1077   :  { %v3521_v3 = vpop.eup %3520 }
0x1078   :  { %v1978_v34 = vmul.f32 %v3521_v3, %v3507_v56 }
0x1079   :  { %v3523_v33 = vpop.eup %3522 }
0x107a   :  { %v1979_v36 = vmul.f32 %v3523_v33, %v3509_v58  ;;  %v3525_v37 = vpop.eup %3524  ;;  %v3442_v58 = vld [vmem:[%s4691_s7 + $0x20] sm:$0xff]  }
0x107b   :  { %v1967_v38 = vsel %vm254_vm1, %v3525_v37, 0.0 }
0x107c   :  { %v1986_v24 = vpack.c.bf16 %v1979_v36, %v1978_v34 }
0x107e   :  { %3225 = vmatmul.mubr.msk.bf16.vlgmr.msra.gmra.mrb[40].mxu1 %vm254_vm1, %v1986_v24 }
0x107f   :  { %3236 = vmatprep.mubr.msk.bf16.mxu1 %vm3875_vm0, %v3874_v0 }
0x1089   :  { %1968 = vadd.xlane.f32.xlu1 %v1967_v38 }
0x109a   :  { %3397 = vrot.lane.b32.xlu1 %v4478_v50, %s3877_s12 }
0x10db   :  { %v1954_v39 = vpop.xlane.xlu0 %1953 }
0x10dc   :  { %3526 = vrcp.f32 %v1954_v39 }
0x10dd   :  { %v1957_v40 = vpop.xlane.xlu1 %1956 }
0x10de   :  { %3528 = vrcp.f32 %v1957_v40 }
0x10df   :  { %v1960_v41 = vpop.xlane.xlu0 %1959 }
0x10e0   :  { %3530 = vrcp.f32 %v1960_v41 }
0x10e1   :  { %v1963_v42 = vpop.xlane.xlu1 %1962 }
0x10e2   :  { %3532 = vrcp.f32 %v1963_v42 }
0x10e3   :  { %v1966_v13 = vpop.xlane.xlu0 %1965 }
0x10e4   :  { %3534 = vrcp.f32 %v1966_v13 }
0x10e5   :  { %v3393_v43 = vpop.permute.xlu1 %3392 }
0x10e6   :  { %v3395_v45 = vunpack.i.h.bf16 %v3393_v43  ;;  %v3394_v46 = vunpack.i.l.bf16 %v3393_v43  ;;  %v3527_v47 = vpop.eup %3526 }
0x10e7   :  { %v3388_v48 = vpop.permute.xlu0 %3387  ;;  %v1980_v53 = vmul.f32 %v3527_v47, %v3511_v14 }
0x10e8   :  { %v3529_v49 = vpop.eup %3528  ;;  %v1680_v27 = vpack.c.bf16 %v3395_v45, %v3394_v46  ;;  %v3390_v28 = vunpack.i.h.bf16 %v3388_v48  ;;  %v3389_v30 = vunpack.i.l.bf16 %v3388_v48 }
0x10e9   :  { %v1981_v51 = vmul.f32 %v3529_v49, %v3513_v16 }
0x10ea   :  { %v3531_v50 = vpop.eup %3530  ;;  %v1679_v52 = vpack.c.bf16 %v3390_v28, %v3389_v30  ;;  %3235 = vmatpush3.bf16.msra.mxu1 %v1680_v27 }
0x10eb   :  { %3246 = vmatprep.subr.bf16.mxu1 %v3874_v0  ;;  %v1982_v55 = vmul.f32 %v3531_v50, %v3515_v18  ;;  %v1987_v57 = vpack.c.bf16 %v1981_v51, %v1980_v53 }
0x10ec   :  { %v3533_v54 = vpop.eup %3532  ;;  %3229 = vmatpush3.bf16.msra.mxu0 %v1679_v52 }
0x10ed   :  { %v1983_v56 = vmul.f32 %v3533_v54, %v3517_v20  ;;  %3240 = vmatprep.subr.bf16.mxu0 %v3874_v0  ;;  %v3445_v20 = vld [vmem:[%s4691_s7 + $0x38] sm:$0xff]   ;;  %s3880_s7 = smov [#allocation22]  }
0x10ee   :  { %v3535_v1 = vpop.eup %3534  ;;  %s2849_s22 = sshll.u32 %s3880_s7, 4  ;;  %s2850_s22 = int_to_ptr.vmem [resolvable:$true] %s2849_s22 }
0x10ef   :  { %3231 = vmatmul.mubr.msk.bf16.vlgmr.msra.gmra.mrb[44].mxu0 %vm254_vm1, %v1987_v57  ;;  %v1988_v44 = vpack.c.bf16 %v1983_v56, %v1982_v55  ;;  %v1984_v4 = vmul.f32 %v3535_v1, %v4530_v22  ;;  %v2960_v56 = vld [vmem:[%s4692_s8 + $0x1] ss:$0 sm:$0xff]  ;;  %s3816_s8 = scalar_lea.vmem %s2850_s22, 256  ;;  %p3821_p13 = scmp.lt.s32.totalorder %s2850_s22, %s2850_s22 }
0x10f0   :  { %3242 = vmatprep.mubr.msk.bf16.mxu0 %vm3875_vm0, %v3874_v0  ;;  %p3817_p12 = scmp.ne.s32.totalorder %s2850_s22, %s3816_s8  ;;  %p3822_p0 = scmp.lt.s32.totalorder %s3816_s8, %s3816_s8 }
0x10f1   :  { %3237 = vmatmul.mubr.msk.bf16.vlgmr.msra.gmra.mrb[44].mxu1 %vm254_vm1, %v1988_v44 }
0x10f2   :  { %3247 = vmatpush3.bf16.msra.mxu1 %v3442_v58  ;;  %3248 = vmatprep.mubr.msk.bf16.mxu1 %vm3875_vm0, %v3874_v0  ;;  %p3823_p1 = por %p3822_p0, %p3821_p13 }
0x10f3   :  { %3258 = vmatprep.subr.bf16.mxu1 %v3874_v0 }
0x10f4   :  { %p3824_p2 = pnand %p3823_p1, %p3817_p12 }
0x1116   :  { %v1969_v59 = vpop.xlane.xlu1 %1968 }
0x1117   :  { %3536 = vrcp.f32 %v1969_v59 }
0x111a   :  { %v3398_v60 = vpop.permute.xlu1 %3397 }
0x111b   :  { %v3400_v61 = vunpack.i.h.bf16 %v3398_v60  ;;  %v3399_v62 = vunpack.i.l.bf16 %v3398_v60 }
0x111d   :  { %v1681_v63 = vpack.c.bf16 %v3400_v61, %v3399_v62 }
0x111f   :  { %3241 = vmatpush3.bf16.msra.mxu0 %v1681_v63 }
0x1120   :  { %3252 = vmatprep.subr.bf16.mxu0 %v3874_v0 }
0x1121   :  { %v3537_v2 = vpop.eup %3536 }
0x1122   :  { %v1985_v5 = vmul.f32 %v3537_v2, %v3525_v37 }
0x1124   :  { %v1989_v6 = vpack.c.bf16 %v1985_v5, %v1984_v4 }
0x1126   :  { %3243 = vmatmul.mubr.msk.bf16.vlgmr.msra.gmra.mrb[48].mxu0 %vm254_vm1, %v1989_v6 }
0x1127   :  { %3254 = vmatprep.mubr.msk.bf16.mxu0 %vm3875_vm0, %v3874_v0  ;;  %3253 = vmatpush3.bf16.msra.mxu0 %v3443_v8 }
0x1128   :  { %3264 = vmatprep.subr.bf16.mxu0 %v3874_v0 }
0x1151   :  { %v2027_v9 = vpop.f32.mrb[40].mxu1 }
0x1152   :  { %v3226_v10 = vpop.f32.mrb[41].mxu1 }
0x1153   :  { %v2030_v11 = vpop.f32.mrb[42].mxu1 }
0x1154   :  { %v2166_v14 = vpack.c.bf16 %v2030_v11, %v2027_v9  ;;  %v3227_v15 = vpop.f32.mrb[43].mxu1 }
0x1156   :  { %3249 = vmatmul.mubr.msk.bf16.vlgmr.msra.gmra.mrb[48].mxu1 %vm254_vm1, %v2166_v14 }
0x1157   :  { %3259 = vmatpush3.bf16.msra.mxu1 %v3444_v12  ;;  %3260 = vmatprep.mubr.msk.bf16.mxu1 %vm3875_vm0, %v3874_v0 }
0x1158   :  { %3270 = vmatprep.subr.bf16.mxu1 %v3874_v0 }
0x11c2   :  { %v2071_v16 = vpop.f32.mrb[44].mxu0 }
0x11c3   :  { %v3232_v17 = vpop.f32.mrb[45].mxu0 }
0x11c4   :  { %v2074_v18 = vpop.f32.mrb[46].mxu0  ;;  %v2115_v19 = vpop.f32.mrb[44].mxu1 }
0x11c5   :  { %v2167_v21 = vpack.c.bf16 %v2074_v18, %v2071_v16  ;;  %v3233_v22 = vpop.f32.mrb[47].mxu0  ;;  %v3238_v25 = vpop.f32.mrb[45].mxu1 }
0x11c6   :  { %v2118_v26 = vpop.f32.mrb[46].mxu1  ;;  %v2961_v25 = vld [vmem:[#allocation8 + $0x1] ss:$0 sm:$0xff] }
0x11c7   :  { %v2168_v29 = vpack.c.bf16 %v2118_v26, %v2115_v19  ;;  %v3239_v31 = vpop.f32.mrb[47].mxu1  ;;  %3255 = vmatmul.mubr.msk.bf16.vlgmr.msra.gmra.mrb[52].mxu0 %vm254_vm1, %v2167_v21 }
0x11c8   :  { %3265 = vmatpush3.bf16.msra.mxu0 %v3445_v20  ;;  %3266 = vmatprep.mubr.msk.bf16.mxu0 %vm3875_vm0, %v3874_v0 }
0x11c9   :  { %3261 = vmatmul.mubr.msk.bf16.vlgmr.msra.gmra.mrb[52].mxu1 %vm254_vm1, %v2168_v29  ;;  %3282 = vmatprep.subr.bf16.mxu0 %v3874_v0  ;;  %v2962_v29 = vld [vmem:[#allocation10 + $0x1] ss:$0 sm:$0xff] }
0x11ca   :  { %3278 = vmatprep.mubr.msk.bf16.mxu1 %vm3875_vm0, %v3874_v0 }
0x11f9   :  { %v2159_v32 = vpop.f32.mrb[48].mxu0 }
0x11fa   :  { %v3244_v3 = vpop.f32.mrb[49].mxu0 }
0x11fb   :  { %v2162_v7 = vpop.f32.mrb[50].mxu0  ;;  %v2963_v3 = vld [vmem:[#allocation7 + $0x1] ss:$0 sm:$0xff] }
0x11fc   :  { %v2169_v33 = vpack.c.bf16 %v2162_v7, %v2159_v32  ;;  %v3245_v34 = vpop.f32.mrb[51].mxu0 }
0x11fe   :  { %3267 = vmatmul.mubr.msk.bf16.vlgmr.msra.gmra.mrb[56].mxu0 %vm254_vm1, %v2169_v33 }
0x11ff   :  { %3298 = vmatprep.mubr.msk.bf16.mxu0 %vm3875_vm0, %v3874_v0 }
0x1229   :  { %v2222_v36 = vpop.f32.mrb[48].mxu1 }
0x122a   :  { %v3250_v24 = vpop.f32.mrb[49].mxu1  ;;  %v2379_v40 = vsel %vm366_vm2, %v2222_v36, 0.0 }
0x122b   :  { %v2225_v37 = vpop.f32.mrb[50].mxu1 }
0x122c   :  { %v3251_v38 = vpop.f32.mrb[51].mxu1  ;;  %v2386_v46 = vsel %vm366_vm2, %v2225_v37, 0.0 }
0x129a   :  { %v2272_v39 = vpop.f32.mrb[52].mxu0 }
0x129b   :  { %v2380_v41 = vsel %vm366_vm2, %v2272_v39, 0.0  ;;  %v3256_v42 = vpop.f32.mrb[53].mxu0 }
0x129c   :  { %v2381_v13 = vadd.f32 %v2380_v41, %v2379_v40  ;;  %v2275_v43 = vpop.f32.mrb[54].mxu0  ;;  %v2322_v45 = vpop.f32.mrb[52].mxu1 }
0x129d   :  { %v2387_v47 = vsel %vm366_vm2, %v2275_v43, 0.0  ;;  %v2382_v48 = vsel %vm366_vm2, %v2322_v45, 0.0  ;;  %v3257_v49 = vpop.f32.mrb[55].mxu0  ;;  %v3262_v27 = vpop.f32.mrb[53].mxu1 }
0x129e   :  { %v2388_v28 = vadd.f32 %v2387_v47, %v2386_v46  ;;  %v2383_v30 = vadd.f32 %v2382_v48, %v2381_v13  ;;  %v2325_v51 = vpop.f32.mrb[54].mxu1  ;;  %v3446_v27 = vld [vmem:[#allocation17 + $0x20] sm:$0xff]  }
0x129f   :  { %v2389_v50 = vsel %vm366_vm2, %v2325_v51, 0.0  ;;  %v3263_v52 = vpop.f32.mrb[55].mxu1  ;;  %3271 = vmatpush3.bf16.msra.mxu1 %v3446_v27  ;;  %v3449_v51 = vld [vmem:[#allocation17 + $0x38] sm:$0xff]  }
0x12a0   :  { %v2390_v53 = vadd.f32 %v2389_v50, %v2388_v28  ;;  %3272 = vmatprep.subr.bf16.mxu1 %v3874_v0  ;;  %v3447_v28 = vld [vmem:[#allocation17 + $0x28] sm:$0xff]   ;;  %v3450_v50 = vld [vmem:[%s4702_s18 + $0x40] sm:$0xff]   ;;  %v3461_v27 = vld [vmem:[%s4704_s20 + $0x18] sm:$0xff]  }
0x12a1   :  { %3283 = vmatpush3.bf16.msra.mxu0 %v3450_v50  ;;  %v3451_v52 = vld [vmem:[%s4702_s18 + $0x48] sm:$0xff]  }
0x12a2   :  { %3284 = vmatprep.subr.bf16.mxu0 %v3874_v0 }
0x12a3   :  { %3273 = vmatpush3.bf16.msra.mxu1 %v3447_v28 }
0x12a4   :  { %3274 = vmatprep.subr.bf16.mxu1 %v3874_v0 }
0x12a5   :  { %3285 = vmatpush3.bf16.msra.mxu0 %v3451_v52 }
0x12a6   :  { %3286 = vmatprep.subr.bf16.mxu0 %v3874_v0 }
0x12d1   :  { %v2372_v54 = vpop.f32.mrb[56].mxu0 }
0x12d2   :  { %v2384_v55 = vsel %vm366_vm2, %v2372_v54, 0.0  ;;  %v3268_v57 = vpop.f32.mrb[57].mxu0  ;;  %v3453_v54 = vld [vmem:[%s4702_s18 + $0x58] sm:$0xff]  }
0x12d3   :  { %v2385_v58 = vadd.f32 %v2384_v55, %v2383_v30  ;;  %v2375_v44 = vpop.f32.mrb[58].mxu0  ;;  %v3448_v30 = vld [vmem:[#allocation17 + $0x30] sm:$0xff]   ;;  %v3454_v55 = vld [vmem:[%s4702_s18 + $0x60] sm:$0xff]  }
0x12d4   :  { %v2391_v59 = vsel %vm366_vm2, %v2375_v44, 0.0  ;;  %v3269_v60 = vpop.f32.mrb[59].mxu0  ;;  %3275 = vmatpush3.bf16.msra.mxu1 %v3448_v30 }
0x12d5   :  { %v2401_v61 = vadd.f32 %v2960_v56, %v2385_v58  ;;  %v2392_v62 = vadd.f32 %v2391_v59, %v2390_v53  ;;  %3276 = vmatprep.subr.bf16.mxu1 %v3874_v0  ;;  %v3452_v53 = vld [vmem:[%s4702_s18 + $0x50] sm:$0xff]  }
0x12d6   :  { %3287 = vmatpush3.bf16.msra.mxu0 %v3452_v53 }
0x12d7   :  { %v2402_v63 = vadd.f32 %v2960_v56, %v2392_v62  ;;  %v2403_v1 = vadd.f32 %v2401_v61, %v4465_v35  ;;  %3288 = vmatprep.subr.bf16.mxu0 %v3874_v0  ;;  %v3455_v56 = vld [vmem:[%s4702_s18 + $0x68] sm:$0xff]  }
0x12d8   :  { %3277 = vmatpush3.bf16.msra.mxu1 %v3449_v51 }
0x12d9   :  { %v2405_v2 = vsel %vm366_vm2, %v2403_v1, 0.0  ;;  %v2404_v4 = vadd.f32 %v2402_v63, %v4467_v23  ;;  %3302 = vmatprep.subr.bf16.mxu1 %v3874_v0 }
0x12da   :  { %2406 = vadd.xlane.f32.xlu0 %v2405_v2  ;;  %3289 = vmatpush3.bf16.msra.mxu0 %v3453_v54 }
0x12db   :  { %v2408_v5 = vsel %vm366_vm2, %v2404_v4, 0.0  ;;  %3290 = vmatprep.subr.bf16.mxu0 %v3874_v0 }
0x12dc   :  { %2409 = vadd.xlane.f32.xlu1 %v2408_v5 }
0x12de   :  { %3291 = vmatpush3.bf16.msra.mxu0 %v3454_v55  ;;  %v2997_v55 = vld [vmem:[#allocation14 + $0x1] ss:$0 sm:$0xff] }
0x12df   :  { %3292 = vmatprep.subr.bf16.mxu0 %v3874_v0 }
0x12e2   :  { %3293 = vmatpush3.bf16.msra.mxu0 %v3455_v56 }
0x12e3   :  { %3294 = vmatprep.subr.bf16.mxu0 %v3874_v0 }
0x1367   :  { %v2407_v6 = vpop.xlane.xlu0 %2406 }
0x1368   :  { %v2411_v8 = vmul.f32 0.015625, %v2407_v6  ;;  %v2965_v6 = vld [vmem:[#allocation13 + $0x1] ss:$0 sm:$0xff] }
0x1369   :  { %v2410_v9 = vpop.xlane.xlu1 %2409 }
0x136a   :  { %v2413_v10 = vsub.f32 %v2403_v1, %v2411_v8  ;;  %v2412_v11 = vmul.f32 0.015625, %v2410_v9  ;;  %v2964_v1 = vld [vmem:[#allocation11 + $0x1] ss:$0 sm:$0xff] }
0x136c   :  { %v2414_v12 = vsub.f32 %v2404_v4, %v2412_v11  ;;  %v2415_v14 = vmul.f32 %v2413_v10, %v2413_v10 }
0x136e   :  { %v2417_v15 = vsel %vm366_vm2, %v2415_v14, 0.0  ;;  %v2416_v16 = vmul.f32 %v2414_v12, %v2414_v12  ;;  %v3457_v14 = vld [vmem:[%s4702_s18 + $0x78] sm:$0xff]  }
0x136f   :  { %2418 = vadd.xlane.f32.xlu0 %v2417_v15  ;;  %v2966_v15 = vld [vmem:[#allocation19 + $0x1] ss:$0 sm:$0xff] }
0x1370   :  { %v2420_v35 = vsel %vm366_vm2, %v2416_v16, 0.0 }
0x1373   :  { %2421 = vadd.xlane.f32.xlu0 %v2420_v35 }
0x13fc   :  { %v2419_v17 = vpop.xlane.xlu0 %2418 }
0x13fd   :  { %v2423_v23 = vmul.f32 0.015625, %v2419_v17 }
0x13ff   :  { %v2425_v18 = vadd.f32 1e-05, %v2423_v23 }
0x1400   :  { %v2422_v19 = vpop.xlane.xlu0 %2421 }
0x1401   :  { %3538 = vrsqrt.f32 %v2425_v18  ;;  %v2424_v20 = vmul.f32 0.015625, %v2422_v19 }
0x1403   :  { %v2426_v21 = vadd.f32 1e-05, %v2424_v20 }
0x1405   :  { %3540 = vrsqrt.f32 %v2426_v21 }
0x140b   :  { %v3539_v22 = vpop.eup %3538 }
0x140c   :  { %v2429_v26 = vmul.f32 %v3539_v22, %v2413_v10 }
0x140e   :  { %v2439_v31 = vmul.f32 %v2961_v25, %v2429_v26 }
0x140f   :  { %v3541_v32 = vpop.eup %3540 }
0x1410   :  { %v2449_v7 = vadd.f32 %v2962_v29, %v2439_v31  ;;  %v2430_v33 = vmul.f32 %v3541_v32, %v2414_v12  ;;  %v3456_v12 = vld [vmem:[%s4702_s18 + $0x70] sm:$0xff]  }
0x1411   :  { %3295 = vmatpush3.bf16.msra.mxu0 %v3456_v12 }
0x1412   :  { %v2459_v34 = vadd.f32 %v2963_v3, %v2449_v7  ;;  %v2440_v36 = vmul.f32 %v2961_v25, %v2430_v33  ;;  %3296 = vmatprep.subr.bf16.mxu0 %v3874_v0  ;;  %v2988_v25 = vld [vmem:[#allocation20 + $0x1] ss:$0 sm:$0xff] }
0x1414   :  { %v2461_v24 = vsel %vm366_vm2, %v2459_v34, 0.0  ;;  %v2450_v37 = vadd.f32 %v2962_v29, %v2440_v36 }
0x1415   :  { %2462 = vadd.xlane.f32.xlu1 %v2461_v24  ;;  %3297 = vmatpush3.bf16.msra.mxu0 %v3457_v14 }
0x1416   :  { %v2460_v38 = vadd.f32 %v2963_v3, %v2450_v37 }
0x1418   :  { %v2464_v39 = vsel %vm366_vm2, %v2460_v38, 0.0 }
0x1419   :  { %2465 = vadd.xlane.f32.xlu0 %v2464_v39 }
0x14a2   :  { %v2463_v40 = vpop.xlane.xlu1 %2462 }
0x14a3   :  { %v2467_v41 = vmul.f32 0.015625, %v2463_v40 }
0x14a5   :  { %v2469_v42 = vsub.f32 %v2459_v34, %v2467_v41 }
0x14a6   :  { %v2466_v13 = vpop.xlane.xlu0 %2465 }
0x14a7   :  { %v2468_v43 = vmul.f32 0.015625, %v2466_v13  ;;  %v2471_v45 = vmul.f32 %v2469_v42, %v2469_v42 }
0x14a9   :  { %v2470_v46 = vsub.f32 %v2460_v38, %v2468_v43  ;;  %v2473_v47 = vsel %vm366_vm2, %v2471_v45, 0.0 }
0x14aa   :  { %2474 = vadd.xlane.f32.xlu1 %v2473_v47  ;;  %v3458_v47 = vld [vmem:[%s4704_s20] sm:$0xff]  }
0x14ab   :  { %v2472_v48 = vmul.f32 %v2470_v46, %v2470_v46 }
0x14ad   :  { %v2476_v49 = vsel %vm366_vm2, %v2472_v48, 0.0  ;;  %v3459_v48 = vld [vmem:[%s4704_s20 + $0x8] sm:$0xff]  }
0x14ae   :  { %2477 = vadd.xlane.f32.xlu0 %v2476_v49  ;;  %v3460_v49 = vld [vmem:[%s4704_s20 + $0x10] sm:$0xff]  }
0x1537   :  { %v2475_v57 = vpop.xlane.xlu1 %2474 }
0x1538   :  { %v2479_v58 = vmul.f32 0.015625, %v2475_v57 }
0x153a   :  { %v2481_v44 = vadd.f32 1e-05, %v2479_v58 }
0x153b   :  { %v2478_v59 = vpop.xlane.xlu0 %2477 }
0x153c   :  { %3542 = vrsqrt.f32 %v2481_v44  ;;  %v2480_v60 = vmul.f32 0.015625, %v2478_v59 }
0x153e   :  { %v2482_v61 = vadd.f32 1e-05, %v2480_v60 }
0x1540   :  { %3544 = vrsqrt.f32 %v2482_v61 }
0x1546   :  { %v3543_v62 = vpop.eup %3542 }
0x1547   :  { %v2485_v63 = vmul.f32 %v3543_v62, %v2469_v42 }
0x1549   :  { %v2495_v4 = vmul.f32 %v2964_v1, %v2485_v63  ;;  %v2999_v63 = vld [vmem:[%s4729_s17] ss:$0 sm:$0xff] }
0x154a   :  { %v3545_v2 = vpop.eup %3544 }
0x154b   :  { %v2486_v5 = vmul.f32 %v3545_v2, %v2470_v46  ;;  %v2505_v9 = vadd.f32 %v2965_v6, %v2495_v4 }
0x154d   :  { %v2496_v8 = vmul.f32 %v2964_v1, %v2486_v5 }
0x154f   :  { %v2506_v10 = vadd.f32 %v2965_v6, %v2496_v8 }
0x1551   :  { %v2507_v11 = vpack.c.bf16 %v2506_v10, %v2505_v9 }
0x1553   :  { %3279 = vmatmul.mubr.msk.bf16.vlgmr.msra.gmra.mrb[56].mxu1 %vm366_vm2, %v2507_v11 }
0x1554   :  { %3310 = vmatprep.mubr.msk.bf16.mxu1 %vm3875_vm0, %v3874_v0  ;;  %3303 = vmatpush3.bf16.msra.mxu1 %v3458_v47 }
0x1555   :  { %3304 = vmatprep.subr.bf16.mxu1 %v3874_v0 }
0x1558   :  { %3305 = vmatpush3.bf16.msra.mxu1 %v3459_v48 }
0x1559   :  { %3306 = vmatprep.subr.bf16.mxu1 %v3874_v0 }
0x155c   :  { %3307 = vmatpush3.bf16.msra.mxu1 %v3460_v49 }
0x155d   :  { %3308 = vmatprep.subr.bf16.mxu1 %v3874_v0  ;;  %v2998_v0 = vld [vmem:[#allocation16 + $0x1] ss:$0 sm:$0xff] }
0x1560   :  { %3309 = vmatpush3.bf16.msra.mxu1 %v3461_v27 }
0x1626   :  { %v2586_v16 = vpop.f32.mrb[56].mxu1 }
0x1627   :  { %v2587_v35 = vadd.f32 %v2966_v15, %v2586_v16  ;;  %v3280_v17 = vpop.f32.mrb[57].mxu1 }
0x1628   :  { %v2589_v23 = vpop.f32.mrb[58].mxu1 }
0x1629   :  { %v2590_v18 = vadd.f32 %v2966_v15, %v2589_v23  ;;  %v3281_v19 = vpop.f32.mrb[59].mxu1  ;;  %v2593_v20 = vmax.f32 %v2587_v35, 0.0 }
0x162b   :  { %v2594_v21 = vmax.f32 %v2590_v18, 0.0 }
0x162d   :  { %v2595_v22 = vpack.c.bf16 %v2594_v21, %v2593_v20 }
0x162f   :  { %3299 = vmatmul.mubr.bf16.vlgmr.msra.gmra.mrb[60].mxu0 %v2595_v22 }
0x1702   :  { %v2703_v26 = vpop.f32.mrb[60].mxu0 }
0x1703   :  { %v2704_v29 = vadd.f32 %v2988_v25, %v2703_v26  ;;  %v3300_v31 = vpop.f32.mrb[61].mxu0 }
0x1704   :  { %v2706_v32 = vpop.f32.mrb[62].mxu0 }
0x1705   :  { %v2707_v3 = vadd.f32 %v2988_v25, %v2706_v32  ;;  %v3301_v7 = vpop.f32.mrb[63].mxu0  ;;  %v2710_v33 = vadd.f32 %v2704_v29, %v2505_v9 }
0x1707   :  { %v2712_v34 = vsel %vm366_vm2, %v2710_v33, 0.0  ;;  %v2711_v36 = vadd.f32 %v2707_v3, %v2506_v10 }
0x1708   :  { %2713 = vadd.xlane.f32.xlu1 %v2712_v34 }
0x1709   :  { %v2715_v24 = vsel %vm366_vm2, %v2711_v36, 0.0 }
0x170a   :  { %2716 = vadd.xlane.f32.xlu0 %v2715_v24 }
0x1795   :  { %v2714_v37 = vpop.xlane.xlu1 %2713 }
0x1796   :  { %v2718_v38 = vmul.f32 0.015625, %v2714_v37 }
0x1797   :  { %v2717_v39 = vpop.xlane.xlu0 %2716 }
0x1798   :  { %v2720_v40 = vsub.f32 %v2710_v33, %v2718_v38  ;;  %v2719_v41 = vmul.f32 0.015625, %v2717_v39 }
0x179a   :  { %v2721_v42 = vsub.f32 %v2711_v36, %v2719_v41  ;;  %v2722_v13 = vmul.f32 %v2720_v40, %v2720_v40 }
0x179c   :  { %v2724_v43 = vsel %vm366_vm2, %v2722_v13, 0.0  ;;  %v2723_v45 = vmul.f32 %v2721_v42, %v2721_v42 }
0x179d   :  { %2725 = vadd.xlane.f32.xlu1 %v2724_v43 }
0x179e   :  { %v2727_v46 = vsel %vm366_vm2, %v2723_v45, 0.0 }
0x179f   :  { %2728 = vadd.xlane.f32.xlu0 %v2727_v46 }
0x182a   :  { %v2726_v28 = vpop.xlane.xlu1 %2725 }
0x182b   :  { %v2730_v30 = vmul.f32 0.015625, %v2726_v28 }
0x182c   :  { %v2729_v51 = vpop.xlane.xlu0 %2728 }
0x182d   :  { %v2732_v50 = vadd.f32 1e-05, %v2730_v30  ;;  %v2731_v52 = vmul.f32 0.015625, %v2729_v51 }
0x182f   :  { %3546 = vrsqrt.f32 %v2732_v50  ;;  %v2733_v53 = vadd.f32 1e-05, %v2731_v52 }
0x1831   :  { %3548 = vrsqrt.f32 %v2733_v53 }
0x1839   :  { %v3547_v54 = vpop.eup %3546 }
0x183a   :  { %v2736_v56 = vmul.f32 %v3547_v54, %v2720_v40 }
0x183b   :  { %v3549_v57 = vpop.eup %3548 }
0x183c   :  { %v2746_v58 = vmul.f32 %v2997_v55, %v2736_v56  ;;  %v2737_v44 = vmul.f32 %v3549_v57, %v2721_v42 }
0x183e   :  { %v2747_v59 = vmul.f32 %v2997_v55, %v2737_v44  ;;  %v2756_v60 = vadd.f32 %v2998_v0, %v2746_v58 }
0x1840   :  { %v2757_v61 = vadd.f32 %v2998_v0, %v2747_v59 }
0x1842   :  { %v2758_v62 = vpack.c.bf16 %v2757_v61, %v2756_v60 }
0x1844   :  { %3311 = vmatmul.mubr.msk.bf16.vlgmr.msra.gmra.mrb[60].mxu1 %vm366_vm2, %v2758_v62 }
0x1917   :  { %v2835_v1 = vpop.f32.mrb[60].mxu1 }
0x1918   :  { %v2836_v2 = vadd.f32 %v2999_v63, %v2835_v1  ;;  %v3312_v4 = vpop.f32.mrb[61].mxu1 }
0x1919   :  { %v2838_v5 = vpop.f32.mrb[62].mxu1 }
0x191a   :  { %2842 = vst.msk [vmem:[#allocation22] sm:$0xff] %vm254_vm1, %v2836_v2  ;;  %v2839_v6 = vadd.f32 %v2999_v63, %v2838_v5  ;;  %v3313_v8 = vpop.f32.mrb[63].mxu1 }
0x191c   :  { %2843 = vst.msk [vmem:[#allocation22 + $0x8] sm:$0xff] %vm254_vm1, %v2839_v6 }
0x191d   :  { %3827 = shalt.err (!%p3824_p2)
}
0x191e   :  { %s4730_s25 = sld [smem:[#allocation39_spill]] }
0x1924   :  { %s3828_s3 = scalar_lea.hbm %s4730_s25, 256 }
0x1925   :  { %p3829_p3 = scmp.ne.s32.totalorder %s4730_s25, %s3828_s3  ;;  %p3832_p4 = scmp.lt.u32.totalorder %s3828_s3, %s4730_s25 }
0x1927   :  { %p3834_p5 = pnand %p3832_p4, %p3829_p3 }
0x1929   :  { %3837 = shalt.err (!%p3834_p5)
}
0x192a   :  { %2855 = dma.vmem_to_hbm [thread:$0]  %s2850_s22, 256, %s4730_s25, [#allocation4], %s3866_s16, %s3866_s16, %s3867_s26  }
0x192b   :  { %3852 = dma.done.wait [#allocation4], 256  }
0x192c   :  { %3853 = vsyncadd [#allocation4], 4294967040 }
0x192d   :  { %2859 = vsyncpa [#allocation3], 1 }
0x192e   :  { %2860 = vsyncpa [#allocation6], 1 }
0x192f   :  { %2861 = vsyncpa [#allocation9], 1 }
0x1930   :  { %2862 = vsyncpa [#allocation12], 1 }
0x1931   :  { %2863 = vsyncpa [#allocation15], 1 }
0x1932   :  { %2864 = vsyncpa [#allocation18], 1 }
0x1933   :  { %2865 = vsyncpa [#allocation21], 1 }
0x1934   :  { %2866 = vsyncpa [#allocation4], 1 }

</bundles_post_ra>
